<compile_context>
chip_gen: v5e
topology: v5e:2x2
jax: 0.10.0
libtpu: 0.0.40
codegen_flags: <defaults>
</compile_context>

<pallas_src>
import functools

import jax
import jax.numpy as jnp
from jax.experimental import pallas as pl
from jax.experimental.pallas import tpu as pltpu


def copy_summ_kernel(use_cache,                          # static, bound via partial
                     occ_ref,                            # SMEM scalar prefetch (gb, num_v)
                     words_ref, dec_ref, wv_ref, aw_ref,
                     wgenT_ref, bgen_ref, wp_dec_ref, wp_ctx_ref, bp_ref,
                     out_ref, ctx_ref,
                     p_sc, m_sc, l_sc, cache_sc=None):
    g = pl.program_id(0)          # batch block
    ph = pl.program_id(1)         # 0: softmax stats, 1: emit output
    v = pl.program_id(2)          # vocab tile

    bb, T, S = aw_ref.shape
    tile_v = wgenT_ref.shape[1]
    rows = bb * T                 # folded MXU M dimension

    # ---- once per batch block: context, copy gate, running-stat init --------
    @pl.when(jnp.logical_and(ph == 0, v == 0))
    def _init():
        # attn_context_word = attn_word @ word_vec   (bf16 MXU, f32 accumulate)
        ctx = jnp.einsum('bts,bsh->bth', aw_ref[...], wv_ref[...],
                         preferred_element_type=jnp.float32)
        ctx_ref[...] = ctx

        # p = sigmoid(W_p [dec; ctx] + b_p): VPU multiply + lane reduction
        # (an N=1 MXU matmul would waste the systolic array).
        gd = jnp.sum(dec_ref[...] * wp_dec_ref[...], axis=-1, keepdims=True)
        gc = jnp.sum(ctx * wp_ctx_ref[...][None], axis=-1, keepdims=True)
        p_sc[...] = jax.nn.sigmoid(gd + gc.reshape(rows, 1) + bp_ref[...])

        # online-softmax running state
        m_sc[...] = jnp.full(m_sc.shape, -jnp.inf, m_sc.dtype)
        l_sc[...] = jnp.zeros(l_sc.shape, l_sc.dtype)

    def _logits_from_w():
        # (bb*T, H) @ (H, TV) on the MXU, f32 accumulation, plus bias.
        return (jnp.dot(dec_ref[...], wgenT_ref[...],
                        preferred_element_type=jnp.float32) + bgen_ref[...])

    def _accumulate_stats(logits):
        m_prev = m_sc[...]
        m_new = jnp.maximum(m_prev, jnp.max(logits, axis=-1, keepdims=True))
        alpha = jnp.exp(m_prev - m_new)
        l_sc[...] = alpha * l_sc[...] + jnp.sum(jnp.exp(logits - m_new),
                                                axis=-1, keepdims=True)
        m_sc[...] = m_new

    def _emit(logits):
        inv_l = pl.reciprocal(l_sc[...], approx=True)          # EUP slot, ~free
        p = p_sc[...]
        gen_term = p * (jnp.exp(logits - m_sc[...]) * inv_l)   # p * softmax tile

        # Occupancy mask: only tiles that actually contain one of this batch
        # block's source ids pay for the one-hot build + copy matmul.
        has_ids = occ_ref[g, v] != 0

        @pl.when(has_ids)
        def _with_copy():
            base = v * tile_v
            ids = words_ref[...] - base                            # (bb, 1, S)
            row = jax.lax.broadcasted_iota(jnp.int32, (bb, tile_v, S), 1)
            onehot = (ids == row).astype(jnp.bfloat16)             # (bb, TV, S)
            # scatter_add over the vocab tile == attn_word @ one_hot(ids)^T
            # (duplicate ids accumulate correctly).
            av = jnp.einsum('bts,bvs->btv', aw_ref[...], onehot,
                            preferred_element_type=jnp.float32)    # (bb, T, TV)
            out_ref[...] = gen_term + (1.0 - p) * av.reshape(rows, tile_v)

        @pl.when(jnp.logical_not(has_ids))
        def _gen_only():
            out_ref[...] = gen_term

    if use_cache:
        # Phase 0 streams W_gen tiles once and caches post-bias logits (bf16);
        # phase 1 re-uses them -> weights read from HBM once per batch block.
        @pl.when(ph == 0)
        def _phase0():
            logits = _logits_from_w()
            _accumulate_stats(logits)
            cache_sc[v] = logits.astype(jnp.bfloat16)

        @pl.when(ph == 1)
        def _phase1():
            _emit(cache_sc[v].astype(jnp.float32))
    else:
        # Recompute path (tight VMEM, e.g. v7x with large bb*T*V).
        logits = _logits_from_w()

        @pl.when(ph == 0)
        def _phase0():
            _accumulate_stats(logits)

        @pl.when(ph == 1)
        def _phase1():
            _emit(logits)


def _pick_batch_block(batch, t, target_rows=256):
    """Pick bb | batch with bb*t a multiple of 8 (lane/sublane-clean flat M),
    preferring >=2 batch blocks (dual-TC v7x) and MXU M near `target_rows`."""
    legal = [d for d in range(1, batch + 1)
             if batch % d == 0 and ((d * t) % 8 == 0 or d == batch)]
    if not legal:
        return batch

    def score(d):
        rows, nblk = d * t, batch // d
        return (0 if nblk >= 2 else 1,                 # keep the parallel axis >= 2
                0 if rows <= 2 * target_rows else 1,   # don't blow up VMEM
                abs(rows - target_rows))
    return min(legal, key=score)


def abs_word_copy_summarizer(words, dec_out, word_vec, attn_dist,
                             w_gen, b_gen, w_p, b_p,
                             *, tile_v=256, batch_block=None, cache_logits=None):
    """Returns (decoder_outputs_src, out, attn_context_word) like module.forward."""
    B, T, H = dec_out.shape
    _, S, _ = word_vec.shape
    V = w_gen.shape[0]

    assert V % tile_v == 0, "vocab size must be a multiple of the vocab tile"
    num_v = V // tile_v

    bb = batch_block if batch_block is not None else _pick_batch_block(B, T)
    assert B % bb == 0 and ((bb * T) % 8 == 0 or bb == B)
    gb = B // bb
    rows = bb * T

    if cache_logits is None:
        # Adopt the bf16 logits cache whenever it fits comfortably (always at
        # v5e/v6e-style budgets; v7x at large bb*T*V uses the recompute path).
        cache_logits = rows * V * 2 <= 24 * 1024 * 1024

    # ---- wrapper-side layout / dtype prep -----------------------------------
    attn_word = jnp.mean(attn_dist.astype(jnp.float32), axis=1)        # (B,T,S)
    aw_bf = attn_word.astype(jnp.bfloat16)
    dec_bf = dec_out.astype(jnp.bfloat16).reshape(B * T, H)            # flat MXU M
    wv_bf = word_vec.astype(jnp.bfloat16)
    words3 = words.astype(jnp.int32)[:, None, :]                       # (B,1,S) lane-dense
    wgenT = jnp.asarray(w_gen, jnp.float32).T.astype(jnp.bfloat16)     # (H, V)
    bgen2 = jnp.asarray(b_gen, jnp.float32).reshape(1, V)
    wp = jnp.asarray(w_p, jnp.float32).reshape(1, 2 * H)
    wp_dec, wp_ctx = wp[:, :H], wp[:, H:]                              # (1, H) each
    bp2 = jnp.asarray(b_p, jnp.float32).reshape(1, 1)

    # Per-(batch-block, vocab-tile) occupancy table (scalar-prefetched): at most
    # bb*S of the num_v tiles can contain a source id.
    tiles = words.astype(jnp.int32).reshape(gb, bb * S) // tile_v
    occ = (tiles[:, :, None] ==
           jnp.arange(num_v, dtype=jnp.int32)[None, None, :]).any(axis=1)
    occ = occ.astype(jnp.int32)                                        # (gb, num_v)

    if cache_logits:
        # Phase 1 never touches W_gen / b_gen: freeze their block index there.
        w_map = lambda g, ph, v, occ: (0, v * (1 - ph))
    else:
        w_map = lambda g, ph, v, occ: (0, v)

    scratch = [
        pltpu.VMEM((rows, 1), jnp.float32),   # copy gate p
        pltpu.VMEM((rows, 1), jnp.float32),   # running max
        pltpu.VMEM((rows, 1), jnp.float32),   # running denominator
    ]
    if cache_logits:
        scratch.append(pltpu.VMEM((num_v, rows, tile_v), jnp.bfloat16))

    grid_spec = pltpu.PrefetchScalarGridSpec(
        num_scalar_prefetch=1,
        grid=(gb, 2, num_v),
        in_specs=[
            pl.BlockSpec((bb, 1, S), lambda g, ph, v, occ: (g, 0, 0)),    # ids
            pl.BlockSpec((rows, H), lambda g, ph, v, occ: (g, 0)),        # dec (flat, bf16)
            pl.BlockSpec((bb, S, H), lambda g, ph, v, occ: (g, 0, 0)),    # word_vec
            pl.BlockSpec((bb, T, S), lambda g, ph, v, occ: (g, 0, 0)),    # attn_word
            pl.BlockSpec((H, tile_v), w_map),                              # W_gen^T
            pl.BlockSpec((1, tile_v), w_map),                              # b_gen
            pl.BlockSpec((1, H), lambda g, ph, v, occ: (0, 0)),            # W_p[:, :H]
            pl.BlockSpec((1, H), lambda g, ph, v, occ: (0, 0)),            # W_p[:, H:]
            pl.BlockSpec((1, 1), lambda g, ph, v, occ: (0, 0)),            # b_p
        ],
        out_specs=(
            # Phase-gated: block index frozen through phase 0, so every output
            # tile hits HBM exactly once (after its phase-1 write).
            pl.BlockSpec((rows, tile_v), lambda g, ph, v, occ: (g, v * ph)),
            pl.BlockSpec((bb, T, H), lambda g, ph, v, occ: (g, 0, 0)),     # ctx
        ),
        scratch_shapes=scratch,
    )

    # VMEM limit sized from the actual footprint (double-buffered blocks +
    # scratch), clamped to stay under v7x's 64 MiB at v7x-sized tiles while
    # letting v5e/v6e shapes use more of their 128 MiB for the logits cache.
    vmem_need = (
        2 * (H * tile_v * 2 + tile_v * 4)                              # W + b_gen
        + 2 * (rows * H * 2 + bb * S * H * 2 + bb * T * S * 2
               + bb * 8 * max(S, 128) * 4)                             # activations
        + 2 * (rows * tile_v * 4 + bb * T * H * 4)                     # out + ctx blocks
        + 3 * rows * 128 * 4                                           # p/m/l scratch
        + (num_v * rows * tile_v * 2 if cache_logits else 0)           # logits cache
    )
    vmem_limit = min(100 * 1024 * 1024,
                     max(32 * 1024 * 1024, int(1.5 * vmem_need) + (4 << 20)))

    gen_passes = 1 if cache_logits else 2
    occupied_tiles = min(gb * num_v, B * S)        # upper bound on copy-matmul tiles
    cost = pl.CostEstimate(
        flops=(2 * B * T * V * H * gen_passes             # generator matmul
               + 2 * B * T * S * H                        # context matmul
               + 2 * bb * T * S * tile_v * occupied_tiles),
        transcendentals=2 * B * T * V,                    # exp in both phases
        bytes_accessed=(gen_passes * gb * H * V * 2       # bf16 weight stream
                        + B * T * V * 4                   # output, written once
                        + B * (T * S + S * H) * 2 + B * T * H * 2
                        + B * S * 4
                        + B * T * H * 4),                 # ctx output
    )

    out_flat, ctx = pl.pallas_call(
        functools.partial(copy_summ_kernel, cache_logits),
        out_shape=(jax.ShapeDtypeStruct((B * T, V), jnp.float32),
                   jax.ShapeDtypeStruct((B, T, H), jnp.float32)),
        grid_spec=grid_spec,
        compiler_params=pltpu.CompilerParams(
            dimension_semantics=("parallel", "arbitrary", "arbitrary"),
            vmem_limit_bytes=vmem_limit),
        cost_estimate=cost,
    )(occ, words3, dec_bf, wv_bf, aw_bf,
      wgenT, bgen2, wp_dec, wp_ctx, bp2)

    return dec_out, out_flat.reshape(B, T, V), ctx


def reference(words, dec_out, word_vec, attn_dist, w_gen, b_gen, w_p, b_p):
    V = w_gen.shape[0]
    attn_word = jnp.mean(attn_dist, axis=1)                        # (B, T, S)
    ctx = jnp.einsum('bts,bsh->bth', attn_word, word_vec)          # (B, T, H)
    gen = jax.nn.softmax(dec_out @ w_gen.T + b_gen, axis=-1)       # (B, T, V)
    onehot = jax.nn.one_hot(words, V, dtype=jnp.float32)           # (B, S, V)
    attn_value = jnp.einsum('bts,bsv->btv', attn_word, onehot)     # (B, T, V)
    p = jax.nn.sigmoid(
        jnp.concatenate([dec_out, ctx], axis=-1) @ w_p.T + b_p)    # (B, T, 1)
    return dec_out, p * gen + (1.0 - p) * attn_value, ctx


if __name__ == "__main__":
    B, T, S, H, HEADS, V = 2, 8, 16, 32, 4, 512

    key = jax.random.PRNGKey(0)
    k1, k2, k3, k4, k5, k6 = jax.random.split(key, 6)

    # Synthetic encoder / decoder activations (external modules in the original).
    word_vec = jax.random.normal(k1, (B, S, H), dtype=jnp.float32)
    dec_out = jax.random.normal(k2, (B, T, H), dtype=jnp.float32)
    attn_dist = jax.nn.softmax(
        jax.random.normal(k3, (B, HEADS, T, S), dtype=jnp.float32), axis=-1)
    words = jax.random.randint(k4, (B, S), 0, V, dtype=jnp.int32)

    # Parameter init matching the module (normal(0, 0.02) weights, zero biases).
    w_gen = 0.02 * jax.random.normal(k5, (V, H), dtype=jnp.float32)
    b_gen = jnp.zeros((V,), dtype=jnp.float32)
    w_p = 0.02 * jax.random.normal(k6, (1, 2 * H), dtype=jnp.float32)
    b_p = jnp.zeros((1,), dtype=jnp.float32)

    dec_r, out_r, ctx_r = reference(
        words, dec_out, word_vec, attn_dist, w_gen, b_gen, w_p, b_p)

    # Cached-logits path (v5e/v6e-style budget) -- the default here.
    dec_k, out_k, ctx_k = abs_word_copy_summarizer(
        words, dec_out, word_vec, attn_dist, w_gen, b_gen, w_p, b_p)
    jax.block_until_ready((dec_k, out_k, ctx_k))

    assert out_k.shape == (B, T, V) and ctx_k.shape == (B, T, H)
    # bf16 MXU operands / bf16 logits cache (f32 accumulation) => loose tolerance.
    assert jnp.allclose(ctx_k, ctx_r, atol=2e-2, rtol=2e-2)
    assert jnp.allclose(out_k, out_r, atol=1e-2, rtol=1e-2)
    assert jnp.allclose(dec_k, dec_r)

    # Recompute path (v7x fallback when the logits cache would not fit in VMEM).
    _, out_k2, ctx_k2 = abs_word_copy_summarizer(
        words, dec_out, word_vec, attn_dist, w_gen, b_gen, w_p, b_p,
        cache_logits=False)
    jax.block_until_ready((out_k2, ctx_k2))
    assert jnp.allclose(ctx_k2, ctx_r, atol=2e-2, rtol=2e-2)
    assert jnp.allclose(out_k2, out_r, atol=1e-2, rtol=1e-2)

    print("KERNEL_OK")
</pallas_src>

<mosaic_0001>
module attributes {stable_mosaic.version = 11 : i64} {
  func.func @copy_summ_kernel(%arg0: i32, %arg1: i32, %arg2: i32, %arg3: memref<2x2xi32, #tpu.memory_space<smem>>, %arg4: memref<1x1x16xi32, #tpu.memory_space<vmem>>, %arg5: memref<8x32xbf16, #tpu.memory_space<vmem>>, %arg6: memref<1x16x32xbf16, #tpu.memory_space<vmem>>, %arg7: memref<1x8x16xbf16, #tpu.memory_space<vmem>>, %arg8: memref<32x256xbf16, #tpu.memory_space<vmem>>, %arg9: memref<1x256xf32, #tpu.memory_space<vmem>>, %arg10: memref<1x32xf32, #tpu.memory_space<vmem>>, %arg11: memref<1x32xf32, #tpu.memory_space<vmem>>, %arg12: memref<1x1xf32, #tpu.memory_space<vmem>>, %arg13: memref<8x256xf32, #tpu.memory_space<vmem>>, %arg14: memref<1x8x32xf32, #tpu.memory_space<vmem>>, %arg15: memref<8x1xf32, #tpu.memory_space<vmem>>, %arg16: memref<8x1xf32, #tpu.memory_space<vmem>>, %arg17: memref<8x1xf32, #tpu.memory_space<vmem>>, %arg18: memref<2x8x256xbf16, #tpu.memory_space<vmem>>) attributes {dimension_semantics = [#tpu.dimension_semantics<parallel>, #tpu.dimension_semantics<arbitrary>, #tpu.dimension_semantics<arbitrary>], iteration_bounds = array<i64: 2, 2, 2>, scalar_prefetch = 1 : i64, scratch_operands = 4 : i64, tpu.core_type = #tpu.core_type<tc>, window_params = [{transform_indices = @transform_0, window_bounds = array<i64: 1, 1, 16>}, {transform_indices = @transform_1, window_bounds = array<i64: 8, 32>}, {transform_indices = @transform_2, window_bounds = array<i64: 1, 16, 32>}, {transform_indices = @transform_3, window_bounds = array<i64: 1, 8, 16>}, {transform_indices = @transform_4, window_bounds = array<i64: 32, 256>}, {transform_indices = @transform_5, window_bounds = array<i64: 1, 256>}, {pipeline_mode = #tpu.pipeline_mode<synchronous>, transform_indices = @transform_6, window_bounds = array<i64: 1, 32>}, {pipeline_mode = #tpu.pipeline_mode<synchronous>, transform_indices = @transform_7, window_bounds = array<i64: 1, 32>}, {pipeline_mode = #tpu.pipeline_mode<synchronous>, transform_indices = @transform_8, window_bounds = array<i64: 1, 1>}, {transform_indices = @transform_9, window_bounds = array<i64: 8, 256>}, {transform_indices = @transform_10, window_bounds = array<i64: 1, 8, 32>}]} {
    %c0_i32 = arith.constant 0 : i32
    %0 = arith.cmpi eq, %arg1, %c0_i32 : i32
    %c0_i32_0 = arith.constant 0 : i32
    %1 = arith.cmpi eq, %arg2, %c0_i32_0 : i32
    %2 = arith.andi %0, %1 : i1
    %3 = arith.extui %2 : i1 to i32
    %c0_i32_1 = arith.constant 0 : i32
    %4 = arith.cmpi ne, %3, %c0_i32_1 : i32
    scf.if %4 {
      %c0 = arith.constant 0 : index
      %c0_5 = arith.constant 0 : index
      %c0_6 = arith.constant 0 : index
      %11 = vector.load %arg7[%c0, %c0_5, %c0_6] : memref<1x8x16xbf16, #tpu.memory_space<vmem>>, vector<1x8x16xbf16>
      %c0_7 = arith.constant 0 : index
      %c0_8 = arith.constant 0 : index
      %c0_9 = arith.constant 0 : index
      %12 = vector.load %arg6[%c0_7, %c0_8, %c0_9] : memref<1x16x32xbf16, #tpu.memory_space<vmem>>, vector<1x16x32xbf16>
      "tpu.trace_start"() <{level = 10 : i32, message = "bts,bsh->bth"}> : () -> ()
      %cst = arith.constant dense<0.000000e+00> : vector<1x8x32xf32>
      %13 = tpu.matmul %11, %12, %cst {dimension_numbers = #tpu.dot_dimension_numbers<[2], [1], [1], [2], [0, 0, 0, 1, 1, 2], [0], [0]>} : vector<1x8x16xbf16>, vector<1x16x32xbf16>, vector<1x8x32xf32> -> vector<1x8x32xf32>
      "tpu.trace_stop"() : () -> ()
      %c0_10 = arith.constant 0 : index
      %c0_11 = arith.constant 0 : index
      %c0_12 = arith.constant 0 : index
      %14 = vector.load %arg14[%c0_10, %c0_11, %c0_12] : memref<1x8x32xf32, #tpu.memory_space<vmem>>, vector<1x8x32xf32>
      tpu.vector_store %arg14[%c0_10, %c0_11, %c0_12], %13 {strides = array<i32>} : memref<1x8x32xf32, #tpu.memory_space<vmem>>, vector<1x8x32xf32>,
      %c0_13 = arith.constant 0 : index
      %c0_14 = arith.constant 0 : index
      %15 = vector.load %arg5[%c0_13, %c0_14] : memref<8x32xbf16, #tpu.memory_space<vmem>>, vector<8x32xbf16>
      %c0_15 = arith.constant 0 : index
      %c0_16 = arith.constant 0 : index
      %16 = vector.load %arg10[%c0_15, %c0_16] : memref<1x32xf32, #tpu.memory_space<vmem>>, vector<1x32xf32>
      %17 = arith.extf %15 : vector<8x32xbf16> to vector<8x32xf32>
      %18 = vector.broadcast %16 : vector<1x32xf32> to vector<8x32xf32>
      %19 = arith.mulf %17, %18 : vector<8x32xf32>
      %cst_17 = arith.constant dense<0.000000e+00> : vector<8xf32>
      %20 = vector.multi_reduction <add>, %19, %cst_17 [1] : vector<8x32xf32> to vector<8xf32>
      %21 = vector.shape_cast %20 : vector<8xf32> to vector<8x1xf32>
      %c0_18 = arith.constant 0 : index
      %c0_19 = arith.constant 0 : index
      %22 = vector.load %arg11[%c0_18, %c0_19] : memref<1x32xf32, #tpu.memory_space<vmem>>, vector<1x32xf32>
      %23 = vector.shape_cast %22 : vector<1x32xf32> to vector<1x1x32xf32>
      %24 = vector.broadcast %23 : vector<1x1x32xf32> to vector<1x8x32xf32>
      %25 = arith.mulf %13, %24 : vector<1x8x32xf32>
      %cst_20 = arith.constant dense<0.000000e+00> : vector<1x8xf32>
      %26 = vector.multi_reduction <add>, %25, %cst_20 [2] : vector<1x8x32xf32> to vector<1x8xf32>
      %27 = vector.shape_cast %26 : vector<1x8xf32> to vector<1x8x1xf32>
      %28 = vector.shape_cast %27 : vector<1x8x1xf32> to vector<8x1xf32>
      %29 = arith.addf %21, %28 : vector<8x1xf32>
      %c0_21 = arith.constant 0 : index
      %c0_22 = arith.constant 0 : index
      %30 = vector.load %arg12[%c0_21, %c0_22] : memref<1x1xf32, #tpu.memory_space<vmem>>, vector<1x1xf32>
      %31 = vector.broadcast %30 : vector<1x1xf32> to vector<8x1xf32>
      %32 = arith.addf %29, %31 : vector<8x1xf32>
      %33 = arith.negf %32 : vector<8x1xf32>
      %34 = math.exp %33 : vector<8x1xf32>
      %cst_23 = arith.constant 1.000000e+00 : f32
      %35 = vector.broadcast %cst_23 : f32 to vector<8x1xf32>
      %36 = arith.addf %35, %34 : vector<8x1xf32>
      %37 = arith.divf %35, %36 : vector<8x1xf32>
      %c0_24 = arith.constant 0 : index
      %c0_25 = arith.constant 0 : index
      %38 = vector.load %arg15[%c0_24, %c0_25] : memref<8x1xf32, #tpu.memory_space<vmem>>, vector<8x1xf32>
      tpu.vector_store %arg15[%c0_24, %c0_25], %37 {strides = array<i32>} : memref<8x1xf32, #tpu.memory_space<vmem>>, vector<8x1xf32>,
      %cst_26 = arith.constant 0xFF800000 : f32
      %39 = vector.broadcast %cst_26 : f32 to vector<8x1xf32>
      %c0_27 = arith.constant 0 : index
      %c0_28 = arith.constant 0 : index
      %40 = vector.load %arg16[%c0_27, %c0_28] : memref<8x1xf32, #tpu.memory_space<vmem>>, vector<8x1xf32>
      tpu.vector_store %arg16[%c0_27, %c0_28], %39 {strides = array<i32>} : memref<8x1xf32, #tpu.memory_space<vmem>>, vector<8x1xf32>,
      %cst_29 = arith.constant 0.000000e+00 : f32
      %41 = vector.broadcast %cst_29 : f32 to vector<8x1xf32>
      %c0_30 = arith.constant 0 : index
      %c0_31 = arith.constant 0 : index
      %42 = vector.load %arg17[%c0_30, %c0_31] : memref<8x1xf32, #tpu.memory_space<vmem>>, vector<8x1xf32>
      tpu.vector_store %arg17[%c0_30, %c0_31], %41 {strides = array<i32>} : memref<8x1xf32, #tpu.memory_space<vmem>>, vector<8x1xf32>,
    } else {
    }
    %c0_i32_2 = arith.constant 0 : i32
    %5 = arith.cmpi eq, %arg1, %c0_i32_2 : i32
    %6 = arith.extui %5 : i1 to i32
    %c0_i32_3 = arith.constant 0 : i32
    %7 = arith.cmpi ne, %6, %c0_i32_3 : i32
    scf.if %7 {
      %c0 = arith.constant 0 : index
      %c0_5 = arith.constant 0 : index
      %11 = vector.load %arg5[%c0, %c0_5] : memref<8x32xbf16, #tpu.memory_space<vmem>>, vector<8x32xbf16>
      %c0_6 = arith.constant 0 : index
      %c0_7 = arith.constant 0 : index
      %12 = vector.load %arg8[%c0_6, %c0_7] : memref<32x256xbf16, #tpu.memory_space<vmem>>, vector<32x256xbf16>
      %cst = arith.constant dense<0.000000e+00> : vector<8x256xf32>
      %13 = tpu.matmul %11, %12, %cst {dimension_numbers = #tpu.dot_dimension_numbers<[1], [0], [0], [1], [0, 0, 1, 1], [], []>} : vector<8x32xbf16>, vector<32x256xbf16>, vector<8x256xf32> -> vector<8x256xf32>
      %c0_8 = arith.constant 0 : index
      %c0_9 = arith.constant 0 : index
      %14 = vector.load %arg9[%c0_8, %c0_9] : memref<1x256xf32, #tpu.memory_space<vmem>>, vector<1x256xf32>
      %15 = vector.broadcast %14 : vector<1x256xf32> to vector<8x256xf32>
      %16 = arith.addf %13, %15 : vector<8x256xf32>
      %c0_10 = arith.constant 0 : index
      %c0_11 = arith.constant 0 : index
      %17 = vector.load %arg16[%c0_10, %c0_11] : memref<8x1xf32, #tpu.memory_space<vmem>>, vector<8x1xf32>
      %cst_12 = arith.constant dense<0xFF800000> : vector<8xf32>
      %18 = vector.multi_reduction <maximumf>, %16, %cst_12 [1] : vector<8x256xf32> to vector<8xf32>
      %19 = vector.shape_cast %18 : vector<8xf32> to vector<8x1xf32>
      %20 = arith.maximumf %17, %19 : vector<8x1xf32>
      %21 = arith.subf %17, %20 : vector<8x1xf32>
      %22 = math.exp %21 : vector<8x1xf32>
      %c0_13 = arith.constant 0 : index
      %c0_14 = arith.constant 0 : index
      %23 = vector.load %arg17[%c0_13, %c0_14] : memref<8x1xf32, #tpu.memory_space<vmem>>, vector<8x1xf32>
      %24 = arith.mulf %22, %23 : vector<8x1xf32>
      %25 = vector.broadcast %20 : vector<8x1xf32> to vector<8x256xf32>
      %26 = arith.subf %16, %25 : vector<8x256xf32>
      %27 = math.exp %26 : vector<8x256xf32>
      %cst_15 = arith.constant dense<0.000000e+00> : vector<8xf32>
      %28 = vector.multi_reduction <add>, %27, %cst_15 [1] : vector<8x256xf32> to vector<8xf32>
      %29 = vector.shape_cast %28 : vector<8xf32> to vector<8x1xf32>
      %30 = arith.addf %24, %29 : vector<8x1xf32>
      %c0_16 = arith.constant 0 : index
      %c0_17 = arith.constant 0 : index
      %31 = vector.load %arg17[%c0_16, %c0_17] : memref<8x1xf32, #tpu.memory_space<vmem>>, vector<8x1xf32>
      tpu.vector_store %arg17[%c0_16, %c0_17], %30 {strides = array<i32>} : memref<8x1xf32, #tpu.memory_space<vmem>>, vector<8x1xf32>,
      %c0_18 = arith.constant 0 : index
      %c0_19 = arith.constant 0 : index
      %32 = vector.load %arg16[%c0_18, %c0_19] : memref<8x1xf32, #tpu.memory_space<vmem>>, vector<8x1xf32>
      tpu.vector_store %arg16[%c0_18, %c0_19], %20 {strides = array<i32>} : memref<8x1xf32, #tpu.memory_space<vmem>>, vector<8x1xf32>,
      %33 = arith.truncf %16 : vector<8x256xf32> to vector<8x256xbf16>
      %34 = arith.index_cast %arg2 : i32 to index
      %c0_20 = arith.constant 0 : index
      %c0_21 = arith.constant 0 : index
      %35 = vector.load %arg18[%34, %c0_20, %c0_21] : memref<2x8x256xbf16, #tpu.memory_space<vmem>>, vector<1x8x256xbf16>
      %36 = vector.shape_cast %35 : vector<1x8x256xbf16> to vector<8x256xbf16>
      %37 = vector.shape_cast %33 : vector<8x256xbf16> to vector<1x8x256xbf16>
      tpu.vector_store %arg18[%34, %c0_20, %c0_21], %37 {strides = array<i32>} : memref<2x8x256xbf16, #tpu.memory_space<vmem>>, vector<1x8x256xbf16>,
    } else {
    }
    %c1_i32 = arith.constant 1 : i32
    %8 = arith.cmpi eq, %arg1, %c1_i32 : i32
    %9 = arith.extui %8 : i1 to i32
    %c0_i32_4 = arith.constant 0 : i32
    %10 = arith.cmpi ne, %9, %c0_i32_4 : i32
    scf.if %10 {
      %11 = arith.index_cast %arg2 : i32 to index
      %c0 = arith.constant 0 : index
      %c0_5 = arith.constant 0 : index
      %12 = vector.load %arg18[%11, %c0, %c0_5] : memref<2x8x256xbf16, #tpu.memory_space<vmem>>, vector<1x8x256xbf16>
      %13 = vector.shape_cast %12 : vector<1x8x256xbf16> to vector<8x256xbf16>
      %14 = arith.extf %13 : vector<8x256xbf16> to vector<8x256xf32>
      %c0_6 = arith.constant 0 : index
      %c0_7 = arith.constant 0 : index
      %15 = vector.load %arg17[%c0_6, %c0_7] : memref<8x1xf32, #tpu.memory_space<vmem>>, vector<8x1xf32>
      %16 = tpu.reciprocal %15 {approx = true} : vector<8x1xf32> -> vector<8x1xf32>
      %c0_8 = arith.constant 0 : index
      %c0_9 = arith.constant 0 : index
      %17 = vector.load %arg15[%c0_8, %c0_9] : memref<8x1xf32, #tpu.memory_space<vmem>>, vector<8x1xf32>
      %c0_10 = arith.constant 0 : index
      %c0_11 = arith.constant 0 : index
      %18 = vector.load %arg16[%c0_10, %c0_11] : memref<8x1xf32, #tpu.memory_space<vmem>>, vector<8x1xf32>
      %19 = vector.broadcast %18 : vector<8x1xf32> to vector<8x256xf32>
      %20 = arith.subf %14, %19 : vector<8x256xf32>
      %21 = math.exp %20 : vector<8x256xf32>
      %22 = vector.broadcast %16 : vector<8x1xf32> to vector<8x256xf32>
      %23 = arith.mulf %21, %22 : vector<8x256xf32>
      %24 = vector.broadcast %17 : vector<8x1xf32> to vector<8x256xf32>
      %25 = arith.mulf %24, %23 : vector<8x256xf32>
      %26 = arith.index_cast %arg0 : i32 to index
      %27 = arith.index_cast %arg2 : i32 to index
      %28 = memref.load %arg3[%26, %27] : memref<2x2xi32, #tpu.memory_space<smem>>
      %c0_i32_12 = arith.constant 0 : i32
      %29 = arith.cmpi ne, %28, %c0_i32_12 : i32
      %30 = arith.extui %29 : i1 to i32
      %c0_i32_13 = arith.constant 0 : i32
      %31 = arith.cmpi ne, %30, %c0_i32_13 : i32
      scf.if %31 {
        %c256_i32 = arith.constant 256 : i32
        %35 = arith.muli %arg2, %c256_i32 : i32
        %c0_15 = arith.constant 0 : index
        %c0_16 = arith.constant 0 : index
        %c0_17 = arith.constant 0 : index
        %36 = vector.load %arg4[%c0_15, %c0_16, %c0_17] : memref<1x1x16xi32, #tpu.memory_space<vmem>>, vector<1x1x16xi32>
        %37 = vector.broadcast %35 : i32 to vector<1x1x16xi32>
        %38 = arith.subi %36, %37 : vector<1x1x16xi32>
        %39 = tpu.iota {dimensions = array<i32: 1>} : vector<1x256x16xi32>
        %40 = vector.broadcast %38 : vector<1x1x16xi32> to vector<1x256x16xi32>
        %41 = arith.cmpi eq, %40, %39 : vector<1x256x16xi32>
        %42 = arith.extui %41 : vector<1x256x16xi1> to vector<1x256x16xi32>
        %43 = arith.sitofp %42 : vector<1x256x16xi32> to vector<1x256x16xf32>
        %44 = arith.truncf %43 : vector<1x256x16xf32> to vector<1x256x16xbf16>
        %c0_18 = arith.constant 0 : index
        %c0_19 = arith.constant 0 : index
        %c0_20 = arith.constant 0 : index
        %45 = vector.load %arg7[%c0_18, %c0_19, %c0_20] : memref<1x8x16xbf16, #tpu.memory_space<vmem>>, vector<1x8x16xbf16>
        "tpu.trace_start"() <{level = 10 : i32, message = "bts,bvs->btv"}> : () -> ()
        %cst = arith.constant dense<0.000000e+00> : vector<1x8x256xf32>
        %46 = tpu.matmul %45, %44, %cst {dimension_numbers = #tpu.dot_dimension_numbers<[2], [2], [1], [1], [0, 0, 0, 1, 1, 1], [0], [0]>} : vector<1x8x16xbf16>, vector<1x256x16xbf16>, vector<1x8x256xf32> -> vector<1x8x256xf32>
        "tpu.trace_stop"() : () -> ()
        %cst_21 = arith.constant 1.000000e+00 : f32
        %47 = vector.broadcast %cst_21 : f32 to vector<8x1xf32>
        %48 = arith.subf %47, %17 : vector<8x1xf32>
        %49 = vector.shape_cast %46 : vector<1x8x256xf32> to vector<8x256xf32>
        %50 = vector.broadcast %48 : vector<8x1xf32> to vector<8x256xf32>
        %51 = arith.mulf %50, %49 : vector<8x256xf32>
        %52 = arith.addf %25, %51 : vector<8x256xf32>
        %c0_22 = arith.constant 0 : index
        %c0_23 = arith.constant 0 : index
        %53 = vector.load %arg13[%c0_22, %c0_23] : memref<8x256xf32, #tpu.memory_space<vmem>>, vector<8x256xf32>
        tpu.vector_store %arg13[%c0_22, %c0_23], %52 {strides = array<i32>} : memref<8x256xf32, #tpu.memory_space<vmem>>, vector<8x256xf32>,
      } else {
      }
      %true = arith.constant true
      %32 = arith.xori %29, %true : i1
      %33 = arith.extui %32 : i1 to i32
      %c0_i32_14 = arith.constant 0 : i32
      %34 = arith.cmpi ne, %33, %c0_i32_14 : i32
      scf.if %34 {
        %c0_15 = arith.constant 0 : index
        %c0_16 = arith.constant 0 : index
        %35 = vector.load %arg13[%c0_15, %c0_16] : memref<8x256xf32, #tpu.memory_space<vmem>>, vector<8x256xf32>
        tpu.vector_store %arg13[%c0_15, %c0_16], %25 {strides = array<i32>} : memref<8x256xf32, #tpu.memory_space<vmem>>, vector<8x256xf32>,
      } else {
      }
    } else {
    }
    return
  }
  func.func @transform_0(%arg0: i32, %arg1: i32, %arg2: i32, %arg3: memref<2x2xi32, #tpu.memory_space<smem>>) -> (i32, i32, i32) {
    %c0_i32 = arith.constant 0 : i32
    %c0_i32_0 = arith.constant 0 : i32
    %c0_i32_1 = arith.constant 0 : i32
    return %arg0, %c0_i32, %c0_i32_0 : i32, i32, i32
  }
  func.func @transform_1(%arg0: i32, %arg1: i32, %arg2: i32, %arg3: memref<2x2xi32, #tpu.memory_space<smem>>) -> (i32, i32) {
    %c0_i32 = arith.constant 0 : i32
    %c0_i32_0 = arith.constant 0 : i32
    return %arg0, %c0_i32 : i32, i32
  }
  func.func @transform_2(%arg0: i32, %arg1: i32, %arg2: i32, %arg3: memref<2x2xi32, #tpu.memory_space<smem>>) -> (i32, i32, i32) {
    %c0_i32 = arith.constant 0 : i32
    %c0_i32_0 = arith.constant 0 : i32
    %c0_i32_1 = arith.constant 0 : i32
    return %arg0, %c0_i32, %c0_i32_0 : i32, i32, i32
  }
  func.func @transform_3(%arg0: i32, %arg1: i32, %arg2: i32, %arg3: memref<2x2xi32, #tpu.memory_space<smem>>) -> (i32, i32, i32) {
    %c0_i32 = arith.constant 0 : i32
    %c0_i32_0 = arith.constant 0 : i32
    %c0_i32_1 = arith.constant 0 : i32
    return %arg0, %c0_i32, %c0_i32_0 : i32, i32, i32
  }
  func.func @transform_4(%arg0: i32, %arg1: i32, %arg2: i32, %arg3: memref<2x2xi32, #tpu.memory_space<smem>>) -> (i32, i32) {
    %c1_i32 = arith.constant 1 : i32
    %0 = arith.subi %c1_i32, %arg1 : i32
    %1 = arith.muli %arg2, %0 : i32
    %c0_i32 = arith.constant 0 : i32
    %c0_i32_0 = arith.constant 0 : i32
    return %c0_i32, %1 : i32, i32
  }
  func.func @transform_5(%arg0: i32, %arg1: i32, %arg2: i32, %arg3: memref<2x2xi32, #tpu.memory_space<smem>>) -> (i32, i32) {
    %c1_i32 = arith.constant 1 : i32
    %0 = arith.subi %c1_i32, %arg1 : i32
    %1 = arith.muli %arg2, %0 : i32
    %c0_i32 = arith.constant 0 : i32
    %c0_i32_0 = arith.constant 0 : i32
    return %c0_i32, %1 : i32, i32
  }
  func.func @transform_6(%arg0: i32, %arg1: i32, %arg2: i32, %arg3: memref<2x2xi32, #tpu.memory_space<smem>>) -> (i32, i32) {
    %c0_i32 = arith.constant 0 : i32
    %c0_i32_0 = arith.constant 0 : i32
    %c0_i32_1 = arith.constant 0 : i32
    return %c0_i32, %c0_i32_0 : i32, i32
  }
  func.func @transform_7(%arg0: i32, %arg1: i32, %arg2: i32, %arg3: memref<2x2xi32, #tpu.memory_space<smem>>) -> (i32, i32) {
    %c0_i32 = arith.constant 0 : i32
    %c0_i32_0 = arith.constant 0 : i32
    %c0_i32_1 = arith.constant 0 : i32
    return %c0_i32, %c0_i32_0 : i32, i32
  }
  func.func @transform_8(%arg0: i32, %arg1: i32, %arg2: i32, %arg3: memref<2x2xi32, #tpu.memory_space<smem>>) -> (i32, i32) {
    %c0_i32 = arith.constant 0 : i32
    %c0_i32_0 = arith.constant 0 : i32
    %c0_i32_1 = arith.constant 0 : i32
    return %c0_i32, %c0_i32_0 : i32, i32
  }
  func.func @transform_9(%arg0: i32, %arg1: i32, %arg2: i32, %arg3: memref<2x2xi32, #tpu.memory_space<smem>>) -> (i32, i32) {
    %0 = arith.muli %arg2, %arg1 : i32
    %c0_i32 = arith.constant 0 : i32
    return %arg0, %0 : i32, i32
  }
  func.func @transform_10(%arg0: i32, %arg1: i32, %arg2: i32, %arg3: memref<2x2xi32, #tpu.memory_space<smem>>) -> (i32, i32, i32) {
    %c0_i32 = arith.constant 0 : i32
    %c0_i32_0 = arith.constant 0 : i32
    %c0_i32_1 = arith.constant 0 : i32
    return %arg0, %c0_i32, %c0_i32_0 : i32, i32, i32
  }
}

</mosaic_0001>

<bundles_post_ra>
// kernel: tpu_custom_call.1
= control target key start
LH: loop header
LB: loop body
LE: loop exit
PB: predicated region body
PF: predicated region fallthrough
CT: control target
= control target key end

     0   :  { %s2129_s22 = smov [#allocation7]   ;;  %s2779_s0 = inlined_call_operand.vmem [shape: s32[2,2], index: 0, kind: input, shape index: {}]   ;;  %s2780_s1 = inlined_call_operand.hbm [shape: s32[2,1,16], index: 1, kind: input, shape index: {}]   ;;  %s2781_s2 = inlined_call_operand.hbm [shape: bf16[16,32], index: 2, kind: input, shape index: {}]   ;;  %s2782_s3 = inlined_call_operand.hbm [shape: bf16[2,16,32], index: 3, kind: input, shape index: {}]   ;;  %s2783_s4 = inlined_call_operand.hbm [shape: bf16[2,8,16], index: 4, kind: input, shape index: {}]   ;;  %s2784_s5 = inlined_call_operand.hbm [shape: bf16[32,512], index: 5, kind: input, shape index: {}]   ;;  %s2785_s6 = inlined_call_operand.vmem [shape: f32[1,512], index: 6, kind: input, shape index: {}]   ;;  %s2786_s7 = inlined_call_operand.vmem [shape: f32[1,32], index: 7, kind: input, shape index: {}]   ;;  %s2787_s8 = inlined_call_operand.vmem [shape: f32[1,32], index: 8, kind: input, shape index: {}]   ;;  %s2788_s10 = inlined_call_operand.hbm [shape: f32[16,512], index: 10, kind: output, shape index: {0}]   ;;  %s2789_s11 = inlined_call_operand.hbm [shape: f32[2,8,32], index: 11, kind: output, shape index: {1}]   ;;  %s2790_s9 = inlined_call_operand.<no memory space> [shape: f32[1,1], index: 9, kind: input, shape index: {}]  }
   0x1   :  { %2822 = sst [smem:[#allocation49_spill]] %s2780_s1  ;;  %s18_s19 = sshll.u32 %s2779_s0, 4  ;;  %v22_v0 = vstv %s2790_s9  ;;  %s19_s19 = int_to_ptr.vmem [resolvable:$true] %s18_s19 }
   0x2   :  { %2823 = sst [smem:[#allocation50_spill]] %s2781_s2  ;;  %23 = vst [vmem:[#allocation8] sm:$0x1] %v22_v0 }
   0x3   :  { %2824 = sst [smem:[#allocation51_spill]] %s2782_s3 }
   0x4   :  { %2825 = sst [smem:[#allocation52_spill]] %s2783_s4 }
   0x5   :  { %2826 = sst [smem:[#allocation53_spill]] %s2784_s5 }
   0x6   :  { %2827 = sst [smem:[#allocation54_spill]] %s2785_s6 }
   0x7   :  { %2828 = sst [smem:[#allocation55_spill]] %s2786_s7 }
   0x8   :  { %2829 = sst [smem:[#allocation56_spill]] %s2787_s8 }
   0x9   :  { %2830 = sst [smem:[#allocation57_spill]] %s2788_s10 }
   0xa   :  { %2831 = sst [smem:[#allocation58_spill]] %s2789_s11 }
   0xb   :  { %21 = dma.vmem_to_smem %s19_s19, 32, %s2129_s22, [#allocation6] }
   0xc   :  { %2039 = dma.done.wait [#allocation6], 32 }
   0xd   :  { %2040 = vsyncadd [#allocation6], 4294967264 }
   0xe   :  { %26 = sfence }
   0xf   :  { %27 = vsyncpa [#allocation10], 0 }
  0x10   :  { %29 = vsyncpa [#allocation10 + $0x1], 0 }
  0x11   :  { %30 = vsyncpa [#allocation13], 0 }
  0x12   :  { %32 = vsyncpa [#allocation13 + $0x1], 0 }
  0x13   :  { %33 = vsyncpa [#allocation16], 0 }
  0x14   :  { %35 = vsyncpa [#allocation16 + $0x1], 0 }
  0x15   :  { %36 = vsyncpa [#allocation11], 0 }
  0x16   :  { %38 = vsyncpa [#allocation11 + $0x1], 0 }
  0x17   :  { %39 = vsyncpa [#allocation20], 0 }
  0x18   :  { %41 = vsyncpa [#allocation20 + $0x1], 0  ;;  %s2207_s0 = smov 0   ;;  %s2209_s9 = smov 0  }
  0x19   :  { %s2211_s23 = smov 0   ;;  %s2213_s24 = smov 0  }
  0x1a   :  { %s2215_s25 = smov 0   ;;  %s2217_s26 = smov 0  }
  0x1b   :  { %s2219_s27 = smov 0   ;;  %s2221_s28 = smov 0  }
  0x1c   :  { %s2223_s29 = smov 0   ;;  %s2225_s30 = smov 0  }
  0x1d   :  { %s2227_s12 = smov 0   ;;  %s2229_s13 = smov 0  }
  0x1e   :  { %s2231_s14 = smov 0   ;;  %s2233_s15 = smov 0  }
  0x1f   :  { %s2235_s16 = smov 0   ;;  %s2237_s17 = smov 0  }
  0x20 LB: > { %2832 = sst [smem:[#allocation28_spill]] %s2067_s0  ;;  %s2288_s18 = sadd.s32 4294967295, %s2127_s17   ;;  %s2127_s17 = sphi %s2237_s17, %s47_s17   ;;  %s2123_s16 = sphi %s2235_s16, %s2912_s16   ;;  %s2119_s15 = sphi %s2233_s15, %s2922_s15   ;;  %s2115_s14 = sphi %s2231_s14, %s2921_s14   ;;  %s2111_s13 = sphi %s2229_s13, %s2920_s13   ;;  %s2107_s12 = sphi %s2227_s12, %s2910_s12   ;;  %s2103_s30 = sphi %s2225_s30, %s2919_s30   ;;  %s2099_s29 = sphi %s2223_s29, %s2909_s29   ;;  %s2095_s28 = sphi %s2221_s28, %s2918_s28   ;;  %s2091_s27 = sphi %s2219_s27, %s2917_s27   ;;  %s2087_s26 = sphi %s2217_s26, %s2916_s26   ;;  %s2083_s25 = sphi %s2215_s25, %s2915_s25   ;;  %s2079_s24 = sphi %s2213_s24, %s2906_s24   ;;  %s2075_s23 = sphi %s2211_s23, %s2905_s23   ;;  %s2071_s9 = sphi %s2209_s9, %s2914_s9   ;;  %s2067_s0 = sphi %s2207_s0, %s2903_s0  }
  0x21   : > { %2833 = sst [smem:[#allocation29_spill]] %s2071_s9  ;;  %s59_s20 = sadd.s32 1, %s2115_s14 }
  0x22   : > { %2834 = sst [smem:[#allocation30_spill]] %s2075_s23  ;;  %s62_s21 = sadd.s32 1, %s2119_s15 }
  0x23   : > { %2835 = sst [smem:[#allocation31_spill]] %s2083_s25  ;;  %p60_p0 = scmp.ge.s32.totalorder %s59_s20, 2 }
  0x24   : > { %2836 = sst [smem:[#allocation32_spill]] %s2091_s27  ;;  %s66_s22 = sadd.s32 1, %s2123_s16 }
  0x25   : > { %2837 = sst [smem:[#allocation33_spill]] %s2099_s29  ;;  %s73_s11 = sadd.s32 1, %s2099_s29 }
  0x26   : > { %2838 = sst [smem:[#allocation34_spill]] %s2103_s30  ;;  %p80_p1 = scmp.ne.s32.totalorder %s2099_s29, %s2095_s28 }
  0x27   : > { %2839 = sst [smem:[#allocation35_spill]] %s2107_s12  ;;  %s2924_s20 = smov (%p60_p0, %s59_s20), 0 }
  0x28   : > { %2840 = sst [smem:[#allocation36_spill]] %s2111_s13  ;;  %s2926_s21 = smov (!%p60_p0, %s62_s21), %s2119_s15 }
  0x29   : > { %2841 = sst [smem:[#allocation37_spill]] %s2119_s15  ;;  %p81_p2 = scmp.eq.s32.totalorder %s2127_s17, 0 }
  0x2a   : > { %2842 = sst [smem:[#allocation38_spill]] %s2123_s16  ;;  %p2803_p3 = scmp.ne.s32.totalorder %s2095_s28, %s2091_s27 }
  0x2b   : > { %2843 = sst [smem:[#allocation39_spill]] %s2127_s17  ;;  %p64_p4 = scmp.ge.s32.totalorder %s2926_s21, 2 }
  0x2c   : > { %p87_p5 = scmp.eq.s32.totalorder %s2288_s18, 0  ;;  %p2307_p6 = por %p81_p2, %p80_p1 }
  0x2d   : > { %p188_p7 = scmp.ne.s32.totalorder %s2087_s26, %s2083_s25  ;;  %s2928_s21 = smov (%p64_p4, %s2926_s21), 0 }
  0x2e   : > { %s2930_s22 = smov (!%p64_p4, %s66_s22), %s2123_s16  ;;  %p2319_p8 = por %p87_p5, %p2803_p3 }
  0x2f   : > { %p2323_p9 = por %p188_p7, %p81_p2  ;;  %p68_p10 = scmp.ge.s32.totalorder %s2930_s22, 2 }
  0x30   : > { %s2845_s10 = scalar_select %p2319_p8, 1, 0 }
  0x31   : > { %p194_p11 = scmp.ne.s32.totalorder %s2083_s25, %s2079_s24  ;;  %s297_s8 = smul.u32 %s2115_s14, %s2119_s15 }
  0x32   : > { %2846 = sst [smem:[#allocation40_spill]] %s2845_s10  ;;  %s304_s7 = sadd.s32 1, %s2075_s23 }
  0x33   : > { %s2932_s22 = smov (%p68_p10, %s2930_s22), 0  ;;  %p2334_p12 = por %p194_p11, %p87_p5 }
  0x34   : > { %2848 = sst [smem:[#allocation41_spill]] %s2932_s22  ;;  %s298_s30 = smul.u32 %s2928_s21, %s2924_s20 }
  0x35   : > { %s2849_s6 = scalar_select %p2334_p12, 1, 0 }
  0x36   : > { %s70_s12 = ssub.s32 %s2123_s16, %s2932_s22  ;;  %p314_p13 = scmp.ne.s32.totalorder %s2075_s23, %s2071_s9 }
  0x37   : > { %2850 = sst [smem:[#allocation42_spill]] %s2849_s6  ;;  %p71_p0 = scmp.eq.s32.totalorder %s70_s12, 0 }
  0x38   : > { %s300_s24 = ssub.s32 %s297_s8, %s298_s30  ;;  %p315_p2 = scmp.eq.s32.totalorder %s2288_s18, 7 }
  0x39   : > { %s301_s25 = sor.u32 %s300_s24, %s70_s12  ;;  %p320_p7 = scmp.ne.s32.totalorder %s2071_s9, %s2067_s0 }
  0x3a   : > { %s2346_s10 = scalar_select %p71_p0, %s2099_s29, %s73_s11  }
  0x3b   : > { %p302_p4 = scmp.eq.s32.totalorder %s301_s25, 0  ;;  %p2348_p5 = por %p315_p2, %p314_p13 }
  0x3c   : > { %2851 = sst [smem:[#allocation43_spill]] %s2346_s10  ;;  %s2854_s5 = sadd.s32 4294967294, %s2127_s17  }
  0x3d   : > { %s2852_s6 = scalar_select %p2348_p5, 1, 0 }
  0x3e   : > { %p321_p10 = scmp.eq.s32.totalorder %s2854_s5, 7  ;;  %p2366_p3 = por %p315_p2, %p80_p1 }
  0x3f   : > { %2853 = sst [smem:[#allocation44_spill]] %s2852_s6  ;;  %p2860_p0 = scmp.ne.s32.totalorder %s2095_s28, %s2091_s27 }
  0x40   : > { %s2357_s22 = scalar_select %p302_p4, %s2075_s23, %s304_s7  }
  0x41   : > { %p2359_p11 = por %p321_p10, %p320_p7  ;;  %p2373_p13 = por %p321_p10, %p2860_p0 }
  0x42   : > { %2855 = sst [smem:[#allocation45_spill]] %s2357_s22  ;;  %p1592_p5 = scmp.lt.s32.totalorder %s2127_s17, 8 }
  0x43   : > { %s2856_s3 = scalar_select %p2359_p11, 1, 0 }
  0x44   : > { %s2858_s8 = scalar_select %p2366_p3, 1, 0 }
  0x45   : > { %2857 = sst [smem:[#allocation46_spill]] %s2856_s3  ;;  %s2379_s5 = sand.u32 1, %s2099_s29  }
  0x46   : > { %2859 = sst [smem:[#allocation47_spill]] %s2858_s8  ;;  %s393_s7 = sand.u32 1, %s2127_s17  }
  0x47   : > { %s2861_s11 = scalar_select %p2373_p13, 1, 0 }
  0x48   : > { %s1452_s25 = sshll.u32 %s2379_s5, 2  ;;  %p2387_p1 = pnand %p1592_p5, %p2307_p6 }
  0x49   : > { %2862 = sst [smem:[#allocation48_spill]] %s2861_s11  ;;  %s1453_s12 = sshll.u32 %s2123_s16, 2 }
  0x4a   : > { %s2864_s2 = sld [smem:[#allocation50_spill]]  ;;  %s397_s11 = scalar_lea.vmem [#allocation12], %s1452_s25 }
  0x4b   : > { %s405_s27 = sshll.u32 %s397_s11, 4  ;;  %s2395_s19 = scalar_lea.sflag [#allocation13], %s393_s7  ;;  %s406_s27 = int_to_ptr.vmem [resolvable:$true] %s405_s27 }
  0x4c   : > { %p2404_p6 = pnand %p1592_p5, %p2323_p9  ;;  %p1462_p2 = scmp.ge.s32.totalorder %s2127_s17, 1 }
  0x4d   : > { %p487_p4 = scmp.lt.s32.totalorder %s2127_s17, 9  ;;  %s2867_s4 = sld [smem:[#allocation52_spill]] }
  0x4e   : > { %s2868_s1 = sld [smem:[#allocation49_spill]]  ;;  %s2131_s8 = smov 4  }
  0x4f   : > { %p2410_p7 = pnand %p1462_p2, %p487_p4  ;;  %s176_s6 = ssub.s32 1, %s2928_s21 }
  0x50   : > { %s401_s22 = scalar_lea.hbm %s2864_s2, %s1453_s12  ;;  %s2417_s2 = scalar_lea.sflag [#allocation16], %s393_s7 }
  0x51   : > { %s403_s23 = sshll.u32 %s401_s22, 4  ;;  %s379_s22 = scalar_lea.vmem [#allocation9], %s2379_s5  ;;  %s404_s23 = int_to_ptr.hbm [resolvable:$true] %s403_s23 }
  0x52   : > { %1575 = dma.hbm_to_vmem [thread:$0]  (!%p2387_p1), %s404_s23, 64, %s406_s27, %s2395_s19  }
  0x53   : > { %s442_s24 = scalar_lea.hbm %s2867_s4, %s1453_s12  ;;  %s438_s27 = scalar_lea.vmem [#allocation15], %s1452_s25 }
  0x54   : > { %s444_s23 = sshll.u32 %s442_s24, 4  ;;  %s446_s13 = sshll.u32 %s438_s27, 4  ;;  %s445_s23 = int_to_ptr.hbm [resolvable:$true] %s444_s23  ;;  %s447_s13 = int_to_ptr.vmem [resolvable:$true] %s446_s13 }
  0x55   : > { %1581 = dma.hbm_to_vmem [thread:$0]  (!%p2387_p1), %s445_s23, 64, %s447_s13, %s2417_s2  }
  0x56   : > { %s382_s17 = scalar_lea.hbm %s2868_s1, %s2123_s16  ;;  %s386_s11 = sshll.u32 %s379_s22, 4  ;;  %s387_s11 = int_to_ptr.vmem [resolvable:$true] %s386_s11 }
  0x57   : > { %s384_s12 = sshll.u32 %s382_s17, 4  ;;  %s1454_s25 = sshll.u32 %s2379_s5, 3  ;;  %s385_s12 = int_to_ptr.hbm [resolvable:$true] %s384_s12 }
  0x58   : > { %s377_s7 = scalar_lea.sflag [#allocation10], %s2379_s5  ;;  %s1546_s24 = sshll.u32 %s2123_s16, 3 }
  0x59   : > { %1572 = dma.hbm_to_vmem [thread:$0]  (!%p2387_p1), %s385_s12, 16, %s387_s11, %s377_s7  }
  0x5a   : > { %s2869_s23 = sld [smem:[#allocation51_spill]]  ;;  %s416_s13 = scalar_lea.vmem [#allocation14], %s1454_s25 }
  0x5b   : > { %s424_s17 = sshll.u32 %s416_s13, 4  ;;  %s174_s1 = ssub.s32 1, %s2119_s15  ;;  %s425_s17 = int_to_ptr.vmem [resolvable:$true] %s424_s17 }
  0x5c   : > { %s2130_s4 = smov 64   ;;  %s175_s5 = smul.u32 %s2115_s14, %s174_s1 }
  0x5d   : > { %s177_s11 = smul.u32 %s176_s6, %s2924_s20  ;;  %s181_s12 = sadd.s32 1, %s2087_s26 }
  0x5e   : > { %s455_s7 = sand.u32 1, %s2087_s26   ;;  %s1547_s3 = sshll.u32 %s175_s5, 3 }
  0x5f   : > { %s1459_s25 = sshll.u32 %s455_s7, 5  ;;  %s2132_s1 = smov 256  }
  0x60   : > { %s421_s27 = scalar_lea.hbm %s2869_s23, %s1546_s24  ;;  %s178_s24 = ssub.s32 %s175_s5, %s177_s11 }
  0x61   : > { %s422_s22 = sshll.u32 %s421_s27, 4  ;;  %p179_p9 = scmp.eq.s32.totalorder %s178_s24, 0  ;;  %s423_s22 = int_to_ptr.hbm [resolvable:$true] %s422_s22 }
  0x62   : > { %1578 = dma.hbm_to_vmem [thread:$0]  (!%p2387_p1), %s423_s22, 128, %s425_s17, %s2395_s19, %s2130_s4, %s2130_s4, %s2131_s8  }
  0x63   : > { %s2870_s27 = sld [smem:[#allocation53_spill]]  ;;  %s457_s16 = scalar_lea.vmem [#allocation17], %s1459_s25 }
  0x64   : > { %s467_s15 = sshll.u32 %s457_s16, 4  ;;  %s2133_s6 = smov 128   ;;  %s468_s15 = int_to_ptr.vmem [resolvable:$true] %s467_s15 }
  0x65   : > { %s2448_s9 = scalar_select %p179_p9, %s2087_s26, %s181_s12  }
  0x66   : > { %s2134_s8 = smov 8   ;;  %s2456_s19 = sand.u32 (!%p2410_p7), 1, %s2095_s28  }
  0x67   : > { %491 = sbr.rel (%p2410_p7) target bundleno = 1351 (0x547), region = 56  ;;  %s494_s16 = scalar_lea.sflag (!%p2410_p7), [#allocation10], %s2456_s19 }
  0x68   : > { %s496_s17 = scalar_lea.vmem (!%p2410_p7), [#allocation9], %s2456_s19 }
  0x69   : > { %s464_s13 = scalar_lea.hbm %s2870_s27, %s1547_s3 }
  0x6a   : > { %s465_s4 = sshll.u32 %s464_s13, 4  ;;  %s466_s4 = int_to_ptr.hbm [resolvable:$true] %s465_s4 }
  0x6b   : > { %1584 = dma.hbm_to_vmem [thread:$0]  (!%p2404_p6), %s466_s4, 512, %s468_s15, %s2417_s2, %s2132_s1, %s2133_s6, %s2134_s8  }
  0x6c   : > { %2042 = dma.done.wait (%p2319_p8), %s494_s16, 16  }
  0x6d   : > { %2044 = vsyncadd (%p2319_p8), %s494_s16, 4294967280  ;;  %s502_s2 = sand.u32 1, %s2288_s18   ;;  %s1463_s29 = sshll.u32 %s2456_s19, 2 }
  0x6e   : > { %s503_s15 = scalar_lea.sflag [#allocation13], %s502_s2  ;;  %s2466_s10 = scalar_lea.vmem [#allocation12], %s1463_s29 }
  0x6f   : > { %2046 = dma.done.wait (%p2319_p8), %s503_s15, 192  }
  0x70   : > { %2048 = vsyncadd (%p2319_p8), %s503_s15, 4294967104  ;;  %s1464_s22 = sshll.u32 %s2456_s19, 3  ;;  %s523_s11 = scalar_lea.sflag [#allocation16], %s502_s2 }
  0x71   : > { %s516_s5 = scalar_lea.vmem [#allocation14], %s1464_s22  ;;  %s2473_s12 = scalar_lea.vmem [#allocation15], %s1463_s29 }
  0x72   : > { %2050 = dma.done.wait (%p2319_p8), %s523_s11, 64  }
  0x73   : > { %2052 = vsyncadd (%p2319_p8), %s523_s11, 4294967232  ;;  %s2872_s18 = sld [smem:[#allocation31_spill]] }
  0x79   : > { %s534_s3 = sand.u32 1, %s2872_s18  }
  0x7a   : > { %s1466_s24 = sshll.u32 %s534_s3, 5 }
  0x7b   : > { %s2480_s25 = scalar_lea.vmem [#allocation17], %s1466_s24 }
  0x7c   : > { %2054 = dma.done.wait (%p2334_p12), %s523_s11, 512  }
  0x7d   : > { %2056 = vsyncadd (%p2334_p12), %s523_s11, 4294966784  ;;  %s2874_s0 = sld [smem:[#allocation29_spill]]  ;;  %s2501_s11 = scalar_lea.vmem [#allocation19], %s1464_s22 }
  0x7e   : > { %s2875_s23 = sld [smem:[#allocation35_spill]] }
  0x7f   : > { %s2876_s27 = sld [smem:[#allocation34_spill]] }
  0x80   : > { %s2877_s2 = sld [smem:[#allocation54_spill]] }
  0x83   : > { %s2821_s13 = sand.u32 1, %s2874_s0  }
  0x84   : > { %s1467_s4 = sshll.u32 %s2821_s13, 4  ;;  %s607_s1 = ssub.s32 1, %s2875_s23 }
  0x85   : > { %s608_s6 = smul.u32 %s2876_s27, %s607_s1  ;;  %p619_p8 = scmp.eq.s32.totalorder %s2875_s23, 0 }
  0x86   : > { %p620_p5 = scmp.eq.s32.totalorder %s2876_s27, 0  ;;  %s2499_s15 = scalar_lea.vmem [#allocation18], %s1467_s4 }
  0x87   : > { %s1469_s8 = sshll.u32 %s608_s6, 1 }
  0x88   : > { %p610_p10 = scmp.lt.s32.totalorder %s1469_s8, 3  ;;  %p621_p0 = pnand %p620_p5, %p619_p8 }
  0x89   : > { %s2878_s3 = sld [smem:[#allocation55_spill]] (!%p621_p0) }
  0x8a   : > { %s2934_s8 = smov (!%p610_p10, %s1469_s8), 3  ;;  %624 = sbr.rel (%p621_p0) target bundleno = 425 (0x1a9), region = 80 }
  0x8b   : > { %s612_s29 = scalar_lea.vmem %s2877_s2, %s2934_s8  ;;  %s2879_s24 = sld [smem:[#allocation56_spill]] (!%p621_p0) }
  0x8f   : > { %v1548_v1 = vld [vmem:[%s516_s5] sm:$0xff]  ;;  %v625_v2 = vld [vmem:[%s2473_s12] sm:$0xf]  ;;  %v653_v3 = vld [vmem:[%s2466_s10] sm:$0xf]  ;;  %vm634_vm0 = vcmask 130048  }
  0x90   : > { %v1734_v4 = vld [vmem:[%s2878_s3] ss:$0 sm:$0xff]  ;;  %645 = vmatpush.bf16.msra.mxu0 %v1548_v1  ;;  %v655_v5 = vunpack.c.l.bf16 %v653_v3  ;;  %vm651_vm1 = vcmask 261120   ;;  %vm696_vm2 = vcmask 7168   ;;  %v2135_v8 = vmov -inf  }
  0x91   : > { %698 = vst.msk [vmem:[#allocation3] sm:$0xff] %vm696_vm2, %v2135_v8  ;;  %v2136_v9 = vmov 0.0   ;;  %v1735_v10 = vld [vmem:[%s2879_s24] ss:$0 sm:$0xff]  ;;  %v1736_v16 = vld [vmem:[#allocation8] ss:$0 sm:$0xff] }
  0x92   : > { %v659_v6 = vmul.f32 %v1734_v4, %v655_v5  ;;  %699 = vst.msk [vmem:[#allocation4] sm:$0xff] %vm696_vm2, %v2136_v9 }
  0x93   : > { %1474 = vmatmul.msk.bf16.vlgmr.msra.gmra.mxu0 %vm634_vm0, %v625_v2 }
  0x94   : > { %v660_v7 = vsel %vm651_vm1, %v659_v6, 0.0 }
  0x95   : > { %661 = vadd.xlane.f32.xlu0 %v660_v7 }
 0x108   : > { %v662_v15 = vpop.xlane.xlu0 %661 }
 0x110   : > { %v647_v11 = vpop.f32.mrf.mxu0 }
 0x111   : > { %652 = vst.msk [vmem:[%s2501_s11] sm:$0xff] %vm651_vm1, %v647_v11  ;;  %v667_v12 = vmul.f32 %v1735_v10, %v647_v11 }
 0x113   : > { %v668_v13 = vsel %vm651_vm1, %v667_v12, 0.0 }
 0x114   : > { %669 = vadd.xlane.f32.xlu0 %v668_v13 }
 0x118   : > { %v649_v14 = vpop.f32.mrf.mxu0 }
 0x187   : > { %v670_v17 = vpop.xlane.xlu0 %669 }
 0x188   : > { %v671_v18 = vadd.f32 %v670_v17, %v662_v15 }
 0x18a   : > { %v676_v19 = vadd.f32 %v1736_v16, %v671_v18 }
 0x18c   : > { %v1475_v20 = vmul.f32 -1.442695, %v676_v19 }
 0x18e   : > { %1737 = vpow2.f32 %v1475_v20 }
 0x194   : > { %v1738_v21 = vpop.eup %1737 }
 0x195   : > { %v680_v22 = vadd.f32 1.0, %v1738_v21 }
 0x197   : > { %1739 = vrcp.f32 %v680_v22  ;;  %v692_v26 = vand.u32 2147483648, %v680_v22  ;;  %v690_v28 = vand.u32 2147483647, %v680_v22  ;;  %vm686_vm4 = vweird.f32 %v680_v22 }
 0x199   : > { %v693_v30 = vor.u32 1.1754944e-38, %v692_v26  ;;  %vm691_vm6 = vcmp.eq.f32.partialorder %v690_v28, 8.507059e+37 }
 0x19d   : > { %v1740_v23 = vpop.eup %1739 }
 0x19e   : > { %v682_v24 = vmul.f32 %v1740_v23, %v680_v22  ;;  %vm687_vm3 = vweird.f32 %v1740_v23 }
 0x19f   : > { %vm688_vm5 = vmor %vm686_vm4, %vm687_vm3 }
 0x1a0   : > { %v683_v25 = vsub.f32 1.0, %v682_v24 }
 0x1a2   : > { %v684_v27 = vmul.f32 %v1740_v23, %v683_v25 }
 0x1a4   : > { %v685_v29 = vadd.f32 %v1740_v23, %v684_v27 }
 0x1a6   : > { %v689_v31 = vsel %vm688_vm5, %v1740_v23, %v685_v29 }
 0x1a7   : > { %v694_v32 = vsel %vm691_vm6, %v693_v30, %v689_v31 }
 0x1a8   : > { %697 = vst.msk [vmem:[#allocation2] sm:$0xff] %vm696_vm2, %v694_v32 }
 0x1a9 PF: > { %s2880_s0 = sld [smem:[#allocation35_spill]] }
 0x1af   : > { %p1476_p12 = scmp.ne.s32.totalorder %s2880_s0, 0 }
 0x1b0   : > { %s2881_s23 = sld [smem:[#allocation34_spill]] (!%p1476_p12) }
 0x1b1   : > { %702 = sbr.rel (%p1476_p12) target bundleno = 945 (0x3b1), region = 84 }
 0x1b6   : > { %v1487_v33 = vld [vmem:[%s2480_s25 + $0x10] sm:$0xf]  ;;  %v1552_v34 = vld [vmem:[%s2480_s25 + $0x14] sm:$0xf0]  ;;  %v1551_v35 = vld [vmem:[%s2480_s25 + $0x14] sm:$0xf] }
 0x1b7   : > { %v1488_v36 = vor.u32 %v1552_v34, %v1487_v33  ;;  %v1489_v37 = vld [vmem:[%s2480_s25 + $0x18] sm:$0xf0]  ;;  %v1479_v38 = vld [vmem:[%s2480_s25] sm:$0xf]  ;;  %v1550_v39 = vld [vmem:[%s2480_s25 + $0x4] sm:$0xf0] }
 0x1b8   : > { %v1492_v40 = vor.u32 %v1551_v35, %v1489_v37  ;;  %v1549_v41 = vld [vmem:[%s2480_s25 + $0x4] sm:$0xf]  ;;  %v1481_v42 = vld [vmem:[%s2480_s25 + $0x8] sm:$0xf0]  ;;  %v1480_v43 = vor.u32 %v1550_v39, %v1479_v38  ;;  %vm734_vm7 = vcmask 261120   ;;  %s1553_s6 = sshll.u32 %s2881_s23, 3 }
 0x1b9   : > { %744 = vmatpush.bf16.msra.mxu0 %v1488_v36  ;;  %v1484_v44 = vor.u32 %v1549_v41, %v1481_v42  ;;  %v703_v45 = vld [vmem:[%s2466_s10] sm:$0xf]  ;;  %v708_v46 = vld [vmem:[%s612_s29] sm:$0x3]  ;;  %s795_s25 = scalar_lea.vmem [#allocation5], %s1553_s6  ;;  %v2137_v57 = vmov 0  }
 0x1ba   : > { %757 = vmatpush.bf16.msra.mxu1 %v1492_v40  ;;  %v710_v47 = vperm.slane %v708_v46, 0  ;;  %v711_v48 = vperm.slane %v708_v46, 1  ;;  %1741 = vset.pattern.permute.xlu0 %v2137_v57  ;;  %v764_v58 = vld [vmem:[#allocation3] sm:$0xff]  ;;  %vm789_vm8 = vcmask 7168   ;;  %v772_v8 = vld [vmem:[#allocation4] sm:$0xff] }
 0x1bd   : > { %745 = vmatpush.bf16.msra.mxu0 %v1480_v43 }
 0x1be   : > { %758 = vmatpush.bf16.msra.mxu1 %v1484_v44 }
 0x1c0   : > { %1493 = vmatmul.msk.bf16.vlgmr.msra.gmra.mxu0 %vm734_vm7, %v703_v45 }
 0x1c1   : > { %1494 = vmatmul.msk.bf16.vlgmr.msra.gmra.mxu1 %vm734_vm7, %v703_v45 }
 0x23d   : > { %v747_v49 = vpop.f32.mrf.mxu0 }
 0x23e   : > { %v748_v50 = vadd.f32 %v747_v49, %v710_v47  ;;  %v760_v51 = vpop.f32.mrf.mxu1 }
 0x23f   : > { %v761_v52 = vadd.f32 %v760_v51, %v711_v48 }
 0x241   : > { %v792_v53 = vpack.c.bf16 %v761_v52, %v748_v50  ;;  %v765_v54 = vmax.f32 %v748_v50, %v761_v52 }
 0x243   : > { %796 = vst [vmem:[%s795_s25] sm:$0xff] %v792_v53  ;;  %766 = vmax.xlane.f32.xlu0 %v765_v54 }
 0x245   : > { %v749_v55 = vpop.f32.mrf.mxu0 }
 0x246   : > { %v762_v56 = vpop.f32.mrf.mxu1 }
 0x2b6   : > { %v767_v59 = vpop.xlane.xlu0 %766 }
 0x2b7   : > { %v768_v60 = vmax.f32 %v764_v58, %v767_v59 }
 0x2b9   : > { %v769_v61 = vsub.f32 %v764_v58, %v768_v60  ;;  %791 = vst.msk [vmem:[#allocation3] sm:$0xff] %vm789_vm8, %v768_v60  ;;  %776 = vperm.xlu0 %1741, %v768_v60  }
 0x2bb   : > { %v770_v6 = vmul.f32 1.442695, %v769_v61 }
 0x32b   : > { %v777_v62 = vpop.permute.xlu0 %776 }
 0x32c   : > { %v779_v63 = vsub.f32 %v748_v50, %v777_v62  ;;  %v780_v0 = vsub.f32 %v761_v52, %v777_v62 }
 0x32e   : > { %v781_v1 = vmul.f32 1.442695, %v779_v63  ;;  %v783_v2 = vmul.f32 1.442695, %v780_v0 }
 0x330   : > { %1742 = vpow2.f32 %v781_v1 }
 0x331   : > { %1744 = vpow2.f32 %v783_v2 }
 0x332   : > { %1746 = vpow2.f32 %v770_v6 }
 0x336   : > { %v1743_v3 = vpop.eup %1742 }
 0x337   : > { %v1745_v4 = vpop.eup %1744 }
 0x338   : > { %v785_v5 = vadd.f32 %v1745_v4, %v1743_v3  ;;  %v1747_v7 = vpop.eup %1746 }
 0x339   : > { %v773_v9 = vmul.f32 %v1747_v7, %v772_v8 }
 0x33a   : > { %786 = vadd.xlane.f32.xlu1 %v785_v5 }
 0x3ad   : > { %v787_v10 = vpop.xlane.xlu1 %786 }
 0x3ae   : > { %v788_v11 = vadd.f32 %v787_v10, %v773_v9 }
 0x3b0   : > { %790 = vst.msk [vmem:[#allocation4] sm:$0xff] %vm789_vm8, %v788_v11 }
 0x3b1 PF: > { %s2883_s10 = sld [smem:[#allocation35_spill]] }
 0x3b7   : > { %p1497_p1 = scmp.ne.s32.totalorder %s2883_s10, 1 }
 0x3b8   : > { %s2884_s8 = sld [smem:[#allocation34_spill]] (!%p1497_p1) }
 0x3b9   : > { %800 = sbr.rel (%p1497_p1) target bundleno = 1312 (0x520), region = 88  ;;  %s2885_s30 = sld [smem:[#allocation36_spill]] (!%p1497_p1) }
 0x3be   : > { %v810_v12 = vld [vmem:[#allocation3] sm:$0xff]  ;;  %v807_v13 = vld [vmem:[#allocation4] sm:$0xff]  ;;  %v2534_v14 = vld [vmem:[#allocation2] sm:$0xff]  ;;  %s836_s16 = sshra.s32 %s2884_s8, 7  ;;  %v2138_v15 = vmov 0   ;;  %s841_s18 = sand.u32 127, %s2884_s8 }
 0x3bf   : > { %1748 = vset.pattern.permute.xlu0 %v2138_v15  ;;  %1750 = vrcp.f32 %v807_v13  ;;  %1749 = vset.pattern.permute.xlu1 %v2138_v15  ;;  %s838_s2 = sadd.s32 %s2885_s30, %s836_s16  ;;  %s1554_s22 = sshll.u32 %s2884_s8, 3 }
 0x3c0   : > { %813 = vperm.xlu0 %1748, %v810_v12   ;;  %831 = vperm.xlu1 %1749, %v2534_v14   ;;  %s1500_s29 = sshll.u32 %s838_s2, 7  ;;  %s803_s5 = scalar_lea.vmem [#allocation5], %s1554_s22 }
 0x3c1   : > { %s842_s7 = sadd.s32 %s1500_s29, %s841_s18  ;;  %v804_v17 = vld [vmem:[%s803_s5] sm:$0xff] }
 0x3c2   : > { %s2540_s3 = sld [smem:[#allocation7 + %s842_s7]]  ;;  %v805_v18 = vunpack.c.l.bf16 %v804_v17  ;;  %v806_v19 = vunpack.c.h.bf16 %v804_v17 }
 0x3c5   : > { %v1751_v16 = vpop.eup %1750 }
 0x3c8   : > { %824 = vperm.xlu0 %1748, %v1751_v16   ;;  %p1501_p6 = scmp.eq.s32.totalorder %s2540_s3, 0 }
 0x3c9   : > { %s2886_s24 = sld [smem:[#allocation34_spill]] (!%p1501_p6) }
 0x3cf   : > { %s1502_s0 = sshll.u32 (!%p1501_p6), %s2886_s24, 8 }
 0x432   : > { %v814_v20 = vpop.permute.xlu0 %813  ;;  %v832_v27 = vpop.permute.xlu1 %831 }
 0x433   : > { %v816_v21 = vsub.f32 %v805_v18, %v814_v20  ;;  %v817_v22 = vsub.f32 %v806_v19, %v814_v20 }
 0x435   : > { %v818_v23 = vmul.f32 1.442695, %v816_v21  ;;  %v820_v24 = vmul.f32 1.442695, %v817_v22 }
 0x437   : > { %1752 = vpow2.f32 %v818_v23 }
 0x438   : > { %1754 = vpow2.f32 %v820_v24 }
 0x43a   : > { %v825_v26 = vpop.permute.xlu0 %824 }
 0x43d   : > { %v1753_v25 = vpop.eup %1752  ;;  %847 = sbr.rel (%p1501_p6) target bundleno = 1303 (0x517), region = 92 }
 0x43e   : > { %v1755_v28 = vpop.eup %1754  ;;  %v827_v29 = vmul.f32 %v1753_v25, %v825_v26 }
 0x43f   : > { %v828_v30 = vmul.f32 %v1755_v28, %v825_v26 }
 0x440   : > { %v2543_v31 = vmul.f32 %v832_v27, %v827_v29 }
 0x441   : > { %v2545_v32 = vmul.f32 %v832_v27, %v828_v30 }
 0x442   : > { %v849_v33 = vld [vmem:[%s496_s17] sm:$0x1]  ;;  %v852_v34 = vlaneseq  ;;  %v850_v35 = vstv %s1502_s0  ;;  %vm1095_vm9 = vcmask 130048   ;;  %v2139_v47 = vmov 0.0  }
 0x443   : > { %v851_v36 = vsub.s32 %v849_v33, %v850_v35 }
 0x444   : > { %v2551_v37 = vshrl.u32 %v852_v34, 7 }
 0x445   : > { %v2555_v40 = vperm.slane %v851_v36, 0 }
 0x446   : > { %v867_v38 = vadd.s32 112, %v2551_v37  ;;  %v868_v39 = vadd.s32 120, %v2551_v37  ;;  %v883_v41 = vadd.s32 240, %v2551_v37  ;;  %v884_v42 = vadd.s32 248, %v2551_v37 }
 0x447   : > { %v865_v43 = vadd.s32 96, %v2551_v37  ;;  %v866_v44 = vadd.s32 104, %v2551_v37  ;;  %v881_v45 = vadd.s32 224, %v2551_v37  ;;  %v882_v46 = vadd.s32 232, %v2551_v37 }
 0x448   : > { %vm900_vm10 = vcmp.eq.s32.totalorder %v2555_v40, %v867_v38  ;;  %vm901_vm11 = vcmp.eq.s32.totalorder %v2555_v40, %v868_v39  ;;  %vm916_vm12 = vcmp.eq.s32.totalorder %v2555_v40, %v883_v41  ;;  %vm917_vm13 = vcmp.eq.s32.totalorder %v2555_v40, %v884_v42 }
 0x449   : > { %v1517_v48 = vsel %vm900_vm10, 1.0, %v2139_v47  ;;  %v1518_v49 = vsel %vm901_vm11, 1.0, %v2139_v47  ;;  %v1533_v50 = vsel %vm916_vm12, 1.0, %v2139_v47  ;;  %v1534_v53 = vsel %vm917_vm13, 1.0, %v2139_v47 }
 0x44a   : > { %v996_v51 = vpack.c.bf16 %v1517_v48, %v1517_v48  ;;  %v997_v52 = vpack.c.bf16 %v1518_v49, %v1518_v49  ;;  %v1012_v54 = vpack.c.bf16 %v1533_v50, %v1533_v50  ;;  %v1013_v55 = vpack.c.bf16 %v1534_v53, %v1534_v53 }
 0x44b   : > { %vm898_vm14 = vcmp.eq.s32.totalorder %v2555_v40, %v865_v43  ;;  %vm899_vm15 = vcmp.eq.s32.totalorder %v2555_v40, %v866_v44  ;;  %vm914_vm0 = vcmp.eq.s32.totalorder %v2555_v40, %v881_v45  ;;  %vm915_vm1 = vcmp.eq.s32.totalorder %v2555_v40, %v882_v46 }
 0x44c   : > { %v1061_v56 = vunpack.c.l.b16 %v996_v51  ;;  %v1062_v57 = vunpack.c.l.b16 %v997_v52  ;;  %v1077_v58 = vunpack.c.l.b16 %v1012_v54  ;;  %v1515_v59 = vsel %vm898_vm14, 1.0, %v2139_v47 }
 0x44d   : > { %v1078_v60 = vunpack.c.l.b16 %v1013_v55  ;;  %v1516_v61 = vsel %vm899_vm15, 1.0, %v2139_v47  ;;  %v994_v62 = vpack.c.bf16 %v1515_v59, %v1515_v59  ;;  %v1531_v1 = vsel %vm914_vm0, 1.0, %v2139_v47 }
 0x44e   : > { %v1086_v63 = vpack.c.b16 %v1062_v57, %v1061_v56  ;;  %v995_v0 = vpack.c.bf16 %v1516_v61, %v1516_v61  ;;  %v1532_v2 = vsel %vm915_vm1, 1.0, %v2139_v47  ;;  %v1010_v5 = vpack.c.bf16 %v1531_v1, %v1531_v1 }
 0x44f   : > { %v1094_v3 = vpack.c.b16 %v1078_v60, %v1077_v58  ;;  %v1059_v4 = vunpack.c.l.b16 %v994_v62  ;;  %v1011_v6 = vpack.c.bf16 %v1532_v2, %v1532_v2  ;;  %v863_v9 = vadd.s32 80, %v2551_v37 }
 0x450   : > { %v1121_v7 = vsel %vm1095_vm9, %v1086_v63, 0  ;;  %v1060_v8 = vunpack.c.l.b16 %v995_v0  ;;  %v864_v10 = vadd.s32 88, %v2551_v37  ;;  %v1075_v12 = vunpack.c.l.b16 %v1010_v5 }
 0x451   : > { %1147 = vmatpush.bf16.xpose.msra.mxu0 %v1121_v7  ;;  %v1145_v11 = vsel %vm1095_vm9, %v1094_v3, 0  ;;  %v1076_v13 = vunpack.c.l.b16 %v1011_v6  ;;  %v879_v15 = vadd.s32 208, %v2551_v37  ;;  %vm896_vm2 = vcmp.eq.s32.totalorder %v2555_v40, %v863_v9 }
 0x452   : > { %1160 = vmatpush.bf16.xpose.msra.mxu1 %v1145_v11  ;;  %v1085_v16 = vpack.c.b16 %v1060_v8, %v1059_v4  ;;  %vm897_vm3 = vcmp.eq.s32.totalorder %v2555_v40, %v864_v10  ;;  %v880_v17 = vadd.s32 216, %v2551_v37  ;;  %v1513_v19 = vsel %vm896_vm2, 1.0, %v2139_v47 }
 0x453   : > { %v1093_v18 = vpack.c.b16 %v1076_v13, %v1075_v12  ;;  %v1514_v20 = vsel %vm897_vm3, 1.0, %v2139_v47  ;;  %vm912_vm4 = vcmp.eq.s32.totalorder %v2555_v40, %v879_v15  ;;  %v992_v22 = vpack.c.bf16 %v1513_v19, %v1513_v19 }
 0x454   : > { %v1118_v21 = vsel %vm1095_vm9, %v1085_v16, 0  ;;  %v993_v23 = vpack.c.bf16 %v1514_v20, %v1514_v20  ;;  %vm913_vm5 = vcmp.eq.s32.totalorder %v2555_v40, %v880_v17  ;;  %v1529_v25 = vsel %vm912_vm4, 1.0, %v2139_v47 }
 0x455   : > { %v1142_v24 = vsel %vm1095_vm9, %v1093_v18, 0  ;;  %v1530_v26 = vsel %vm913_vm5, 1.0, %v2139_v47  ;;  %v861_v27 = vadd.s32 64, %v2551_v37  ;;  %v1057_v28 = vunpack.c.l.b16 %v992_v22 }
 0x456   : > { %v1058_v29 = vunpack.c.l.b16 %v993_v23  ;;  %v1008_v30 = vpack.c.bf16 %v1529_v25, %v1529_v25  ;;  %v1009_v33 = vpack.c.bf16 %v1530_v26, %v1530_v26  ;;  %v862_v34 = vadd.s32 72, %v2551_v37 }
 0x457   : > { %vm894_vm6 = vcmp.eq.s32.totalorder %v2555_v40, %v861_v27  ;;  %v877_v35 = vadd.s32 192, %v2551_v37  ;;  %v878_v36 = vadd.s32 200, %v2551_v37  ;;  %v859_v54 = vadd.s32 48, %v2551_v37 }
 0x458   : > { %v1084_v38 = vpack.c.b16 %v1058_v29, %v1057_v28  ;;  %v1073_v39 = vunpack.c.l.b16 %v1008_v30  ;;  %v1074_v41 = vunpack.c.l.b16 %v1009_v33  ;;  %v1511_v42 = vsel %vm894_vm6, 1.0, %v2139_v47 }
 0x459   : > { %1148 = vmatpush.bf16.xpose.msra.mxu0 %v1118_v21  ;;  %vm895_vm7 = vcmp.eq.s32.totalorder %v2555_v40, %v862_v34  ;;  %v990_v43 = vpack.c.bf16 %v1511_v42, %v1511_v42  ;;  %vm910_vm8 = vcmp.eq.s32.totalorder %v2555_v40, %v877_v35  ;;  %vm911_vm10 = vcmp.eq.s32.totalorder %v2555_v40, %v878_v36 }
 0x45a   : > { %1161 = vmatpush.bf16.xpose.msra.mxu1 %v1142_v24  ;;  %v1092_v44 = vpack.c.b16 %v1074_v41, %v1073_v39  ;;  %v1512_v45 = vsel %vm895_vm7, 1.0, %v2139_v47  ;;  %v1527_v46 = vsel %vm910_vm8, 1.0, %v2139_v47  ;;  %v1115_v48 = vsel %vm1095_vm9, %v1084_v38, 0 }
 0x45b   : > { %v991_v49 = vpack.c.bf16 %v1512_v45, %v1512_v45  ;;  %v1528_v50 = vsel %vm911_vm10, 1.0, %v2139_v47  ;;  %v1006_v51 = vpack.c.bf16 %v1527_v46, %v1527_v46  ;;  %v1055_v52 = vunpack.c.l.b16 %v990_v43 }
 0x45c   : > { %v1007_v53 = vpack.c.bf16 %v1528_v50, %v1528_v50  ;;  %v860_v55 = vadd.s32 56, %v2551_v37  ;;  %v1139_v56 = vsel %vm1095_vm9, %v1092_v44, 0  ;;  %v875_v58 = vadd.s32 176, %v2551_v37 }
 0x45d   : > { %v1056_v57 = vunpack.c.l.b16 %v991_v49  ;;  %v876_v59 = vadd.s32 184, %v2551_v37  ;;  %v1071_v60 = vunpack.c.l.b16 %v1006_v51  ;;  %vm892_vm11 = vcmp.eq.s32.totalorder %v2555_v40, %v859_v54 }
 0x45e   : > { %v1072_v61 = vunpack.c.l.b16 %v1007_v53  ;;  %vm893_vm12 = vcmp.eq.s32.totalorder %v2555_v40, %v860_v55  ;;  %v1509_v62 = vsel %vm892_vm11, 1.0, %v2139_v47  ;;  %vm908_vm13 = vcmp.eq.s32.totalorder %v2555_v40, %v875_v58 }
 0x45f   : > { %v1510_v63 = vsel %vm893_vm12, 1.0, %v2139_v47  ;;  %v857_v0 = vadd.s32 32, %v2551_v37  ;;  %v988_v1 = vpack.c.bf16 %v1509_v62, %v1509_v62  ;;  %vm909_vm14 = vcmp.eq.s32.totalorder %v2555_v40, %v876_v59 }
 0x460   : > { %v989_v2 = vpack.c.bf16 %v1510_v63, %v1510_v63  ;;  %v1525_v3 = vsel %vm908_vm13, 1.0, %v2139_v47  ;;  %v1526_v4 = vsel %vm909_vm14, 1.0, %v2139_v47  ;;  %v858_v5 = vadd.s32 40, %v2551_v37 }
 0x461   : > { %1149 = vmatpush.bf16.xpose.msra.mxu0 %v1115_v48  ;;  %v1083_v6 = vpack.c.b16 %v1056_v57, %v1055_v52  ;;  %v1091_v7 = vpack.c.b16 %v1072_v61, %v1071_v60  ;;  %v1004_v8 = vpack.c.bf16 %v1525_v3, %v1525_v3  ;;  %v1005_v9 = vpack.c.bf16 %v1526_v4, %v1526_v4 }
 0x462   : > { %1162 = vmatpush.bf16.xpose.msra.mxu1 %v1139_v56  ;;  %vm890_vm15 = vcmp.eq.s32.totalorder %v2555_v40, %v857_v0  ;;  %vm891_vm0 = vcmp.eq.s32.totalorder %v2555_v40, %v858_v5  ;;  %v873_v10 = vadd.s32 160, %v2551_v37  ;;  %v1053_v11 = vunpack.c.l.b16 %v988_v1 }
 0x463   : > { %v1054_v12 = vunpack.c.l.b16 %v989_v2  ;;  %v874_v13 = vadd.s32 168, %v2551_v37  ;;  %v1112_v15 = vsel %vm1095_vm9, %v1083_v6, 0  ;;  %v1507_v16 = vsel %vm890_vm15, 1.0, %v2139_v47 }
 0x464   : > { %v1508_v17 = vsel %vm891_vm0, 1.0, %v2139_v47  ;;  %vm906_vm1 = vcmp.eq.s32.totalorder %v2555_v40, %v873_v10  ;;  %v1136_v18 = vsel %vm1095_vm9, %v1091_v7, 0  ;;  %v1069_v19 = vunpack.c.l.b16 %v1004_v8 }
 0x465   : > { %v1070_v20 = vunpack.c.l.b16 %v1005_v9  ;;  %vm907_vm2 = vcmp.eq.s32.totalorder %v2555_v40, %v874_v13  ;;  %v1523_v21 = vsel %vm906_vm1, 1.0, %v2139_v47  ;;  %v855_v23 = vadd.s32 16, %v2551_v37 }
 0x466   : > { %v1524_v22 = vsel %vm907_vm2, 1.0, %v2139_v47  ;;  %v856_v24 = vadd.s32 24, %v2551_v37  ;;  %v1082_v25 = vpack.c.b16 %v1054_v12, %v1053_v11  ;;  %v986_v26 = vpack.c.bf16 %v1507_v16, %v1507_v16 }
 0x467   : > { %v987_v27 = vpack.c.bf16 %v1508_v17, %v1508_v17  ;;  %v1002_v28 = vpack.c.bf16 %v1523_v21, %v1523_v21  ;;  %v1003_v29 = vpack.c.bf16 %v1524_v22, %v1524_v22  ;;  %v871_v30 = vadd.s32 144, %v2551_v37 }
 0x468   : > { %v872_v33 = vadd.s32 152, %v2551_v37  ;;  %v1090_v34 = vpack.c.b16 %v1070_v20, %v1069_v19  ;;  %vm888_vm3 = vcmp.eq.s32.totalorder %v2555_v40, %v855_v23  ;;  %vm889_vm4 = vcmp.eq.s32.totalorder %v2555_v40, %v856_v24 }
 0x469   : > { %1150 = vmatpush.bf16.xpose.msra.mxu0 %v1112_v15  ;;  %v1051_v35 = vunpack.c.l.b16 %v986_v26  ;;  %v1052_v36 = vunpack.c.l.b16 %v987_v27  ;;  %vm904_vm5 = vcmp.eq.s32.totalorder %v2555_v40, %v871_v30  ;;  %v1109_v38 = vsel %vm1095_vm9, %v1082_v25, 0 }
 0x46a   : > { %1163 = vmatpush.bf16.xpose.msra.mxu1 %v1136_v18  ;;  %vm905_vm6 = vcmp.eq.s32.totalorder %v2555_v40, %v872_v33  ;;  %v1067_v39 = vunpack.c.l.b16 %v1002_v28  ;;  %v1068_v41 = vunpack.c.l.b16 %v1003_v29  ;;  %v1133_v42 = vsel %vm1095_vm9, %v1090_v34, 0  ;;  %v1014_v18 = vld [vmem:[%s2473_s12] sm:$0xf] }
 0x46b   : > { %v1505_v43 = vsel %vm888_vm3, 1.0, %v2139_v47  ;;  %v1506_v44 = vsel %vm889_vm4, 1.0, %v2139_v47  ;;  %v1521_v45 = vsel %vm904_vm5, 1.0, %v2139_v47  ;;  %v1522_v46 = vsel %vm905_vm6, 1.0, %v2139_v47 }
 0x46c   : > { %v854_v48 = vadd.s32 8, %v2551_v37  ;;  %v1081_v49 = vpack.c.b16 %v1052_v36, %v1051_v35  ;;  %v869_v50 = vadd.s32 128, %v2551_v37  ;;  %v870_v51 = vadd.s32 136, %v2551_v37 }
 0x46d   : > { %v1089_v52 = vpack.c.b16 %v1068_v41, %v1067_v39  ;;  %v984_v53 = vpack.c.bf16 %v1505_v43, %v1505_v43  ;;  %v985_v54 = vpack.c.bf16 %v1506_v44, %v1506_v44  ;;  %v1000_v55 = vpack.c.bf16 %v1521_v45, %v1521_v45 }
 0x46e   : > { %v1001_v56 = vpack.c.bf16 %v1522_v46, %v1522_v46  ;;  %v2140_v57 = vmov 0   ;;  %vm886_vm7 = vcmp.eq.s32.totalorder %v2555_v40, %v2551_v37  ;;  %vm887_vm8 = vcmp.eq.s32.totalorder %v2555_v40, %v854_v48 }
 0x46f   : > { %1756 = vset.pattern.permute.xlu0 %v2140_v57  ;;  %v1173_v58 = vsub.f32 1.0, %v2534_v14  ;;  %vm902_vm10 = vcmp.eq.s32.totalorder %v2555_v40, %v869_v50  ;;  %vm903_vm11 = vcmp.eq.s32.totalorder %v2555_v40, %v870_v51  ;;  %v1106_v59 = vsel %vm1095_vm9, %v1081_v49, 0 }
 0x470   : > { %v1130_v60 = vsel %vm1095_vm9, %v1089_v52, 0  ;;  %v1049_v61 = vunpack.c.l.b16 %v984_v53  ;;  %v1050_v62 = vunpack.c.l.b16 %v985_v54  ;;  %v1065_v63 = vunpack.c.l.b16 %v1000_v55 }
 0x471   : > { %1151 = vmatpush.bf16.xpose.msra.mxu0 %v1109_v38  ;;  %1176 = vperm.xlu0 %1756, %v1173_v58   ;;  %v1066_v0 = vunpack.c.l.b16 %v1001_v56  ;;  %v1503_v1 = vsel %vm886_vm7, 1.0, %v2139_v47  ;;  %v1504_v37 = vsel %vm887_vm8, 1.0, %v2139_v47  ;;  %v1519_v2 = vsel %vm902_vm10, 1.0, %v2139_v47 }
 0x472   : > { %1164 = vmatpush.bf16.xpose.msra.mxu1 %v1133_v42  ;;  %v1520_v14 = vsel %vm903_vm11, 1.0, %v2139_v47  ;;  %v1080_v40 = vpack.c.b16 %v1050_v62, %v1049_v61  ;;  %v982_v3 = vpack.c.bf16 %v1503_v1, %v1503_v1  ;;  %v983_v4 = vpack.c.bf16 %v1504_v37, %v1504_v37 }
 0x473   : > { %v1088_v5 = vpack.c.b16 %v1066_v0, %v1065_v63  ;;  %v998_v6 = vpack.c.bf16 %v1519_v2, %v1519_v2  ;;  %v999_v7 = vpack.c.bf16 %v1520_v14, %v1520_v14 }
 0x474   : > { %v1103_v8 = vsel %vm1095_vm9, %v1080_v40, 0  ;;  %v1047_v9 = vunpack.c.l.b16 %v982_v3  ;;  %v1048_v10 = vunpack.c.l.b16 %v983_v4 }
 0x475   : > { %v1127_v11 = vsel %vm1095_vm9, %v1088_v5, 0  ;;  %v1063_v12 = vunpack.c.l.b16 %v998_v6  ;;  %v1064_v13 = vunpack.c.l.b16 %v999_v7 }
 0x476   : > { %v1079_v47 = vpack.c.b16 %v1048_v10, %v1047_v9 }
 0x477   : > { %v1087_v15 = vpack.c.b16 %v1064_v13, %v1063_v12 }
 0x478   : > { %v1100_v16 = vsel %vm1095_vm9, %v1079_v47, 0 }
 0x479   : > { %1152 = vmatpush.bf16.xpose.msra.mxu0 %v1106_v59  ;;  %v1124_v17 = vsel %vm1095_vm9, %v1087_v15, 0 }
 0x47a   : > { %1165 = vmatpush.bf16.xpose.msra.mxu1 %v1130_v60 }
 0x481   : > { %1153 = vmatpush.bf16.xpose.msra.mxu0 %v1103_v8 }
 0x482   : > { %1166 = vmatpush.bf16.xpose.msra.mxu1 %v1127_v11 }
 0x489   : > { %1154 = vmatpush.bf16.xpose.msra.mxu0 %v1100_v16 }
 0x48a   : > { %1167 = vmatpush.bf16.xpose.msra.mxu1 %v1124_v17 }
 0x490   : > { %1535 = vmatmul.msk.bf16.vlgmr.msra.gmra.mxu0 %vm1095_vm9, %v1014_v18 }
 0x491   : > { %1536 = vmatmul.msk.bf16.vlgmr.msra.gmra.mxu1 %vm1095_vm9, %v1014_v18 }
 0x4e3   : > { %v1177_v19 = vpop.permute.xlu0 %1176 }
 0x50d   : > { %v1156_v20 = vpop.f32.mrf.mxu0 }
 0x50e   : > { %v1179_v21 = vmul.f32 %v1177_v19, %v1156_v20  ;;  %v1169_v22 = vpop.f32.mrf.mxu1 }
 0x50f   : > { %v1180_v23 = vmul.f32 %v1177_v19, %v1169_v22 }
 0x510   : > { %v1181_v24 = vadd.f32 %v1179_v21, %v2543_v31 }
 0x511   : > { %v1182_v25 = vadd.f32 %v1180_v23, %v2545_v32 }
 0x512   : > { %1183 = vst [vmem:[%s2499_s15] sm:$0xff] %v1181_v24 }
 0x513   : > { %1184 = vst [vmem:[%s2499_s15 + $0x8] sm:$0xff] %v1182_v25 }
 0x515   : > { %v1158_v26 = vpop.f32.mrf.mxu0 }
 0x516   : > { %v1171_v27 = vpop.f32.mrf.mxu1 }
 0x517 PF: > { %p1537_p2 = scmp.ne.s32.totalorder %s2540_s3, 0 }
 0x519   : > { %1188 = sbr.rel (%p1537_p2) target bundleno = 1312 (0x520), region = 96 }
 0x51e   : > { %1189 = vst [vmem:[%s2499_s15] sm:$0xff] %v2543_v31 }
 0x51f   : > { %1190 = vst [vmem:[%s2499_s15 + $0x8] sm:$0xff] %v2545_v32 }
 0x520 PF: > { %s2887_s17 = sld [smem:[#allocation35_spill]]  ;;  %s1213_s6 = sshll.u32 %s2499_s15, 4  ;;  %s1214_s6 = int_to_ptr.vmem [resolvable:$true] %s1213_s6 }
 0x521   : > { %s2888_s12 = sld [smem:[#allocation34_spill]]  ;;  %s1227_s13 = sshll.u32 %s2501_s11, 4  ;;  %s2692_s13 = int_to_ptr.vmem [resolvable:$true] %s1227_s13 }
 0x522   : > { %s2889_s23 = sld [smem:[#allocation36_spill]] }
 0x523   : > { %s2890_s27 = sld [smem:[#allocation29_spill]] }
 0x524   : > { %s2891_s10 = sld [smem:[#allocation44_spill]] }
 0x525   : > { %s2892_s18 = sld [smem:[#allocation57_spill]] }
 0x526   : > { %s2893_s5 = sld [smem:[#allocation58_spill]] }
 0x527   : > { %s1204_s4 = smul.u32 %s2888_s12, %s2887_s17 }
 0x528   : > { %s1541_s1 = sshll.u32 %s2889_s23, 2  ;;  %s1543_s16 = sshll.u32 %s2889_s23, 3 }
 0x529   : > { %s1540_s25 = sshll.u32 %s1204_s4, 1  ;;  %s2894_s15 = sand.u32 1, %s2890_s27  }
 0x52a   : > { %s1209_s8 = sadd.s32 %s1541_s1, %s1540_s25  ;;  %s1192_s17 = scalar_lea.sflag [#allocation11], %s2894_s15 }
 0x52b   : > { %s1542_s30 = sshll.u32 %s1209_s8, 3  ;;  %p2895_p7 = scmp.ne.s32.totalorder %s2891_s10, 0 }
 0x52c   : > { %s1211_s7 = scalar_lea.hbm %s2892_s18, %s1542_s30  ;;  %s1225_s24 = scalar_lea.hbm %s2893_s5, %s1543_s16 }
 0x52d   : > { %s1215_s0 = sshll.u32 %s1211_s7, 4  ;;  %s1939_s25 = scalar_lea.hbm %s2892_s18, 64  ;;  %s1216_s0 = int_to_ptr.hbm [resolvable:$true] %s1215_s0 }
 0x52e   : > { %s1933_s12 = sshra.s32 %s1216_s0, 4  ;;  %s1934_s12 = int_to_ptr.hbm [resolvable:$true] %s1933_s12 }
 0x52f   : > { %s1935_s4 = scalar_lea.hbm %s1934_s12, 16  ;;  %p1940_p5 = scmp.lt.s32.totalorder %s1934_s12, %s2892_s18 }
 0x530   : > { %p1936_p4 = scmp.ne.s32.totalorder %s1934_s12, %s1935_s4  ;;  %p1941_p10 = scmp.lt.s32.totalorder %s1939_s25, %s1935_s4 }
 0x532   : > { %p1937_p9 = pnand %p1936_p4, %p2895_p7  ;;  %p1942_p0 = por %p1941_p10, %p1940_p5 }
 0x534   : > { %p1938_p8 = pneg %p1937_p9 }
 0x536   : > { %p1943_p12 = pnand %p1942_p0, %p1938_p8 }
 0x538   : > { %1946 = shalt.err (!%p1943_p12)
}
 0x539   : > { %1565 = dma.vmem_to_hbm [thread:$0]  (%p2895_p7), %s1214_s6, 256, %s1216_s0, %s1192_s17  }
 0x53a   : > { %s1229_s27 = sshll.u32 %s1225_s24, 4  ;;  %s1197_s16 = scalar_lea.sflag [#allocation20], %s2456_s19  ;;  %s1230_s27 = int_to_ptr.hbm [resolvable:$true] %s1229_s27 }
 0x53b   : > { %s1961_s2 = sshra.s32 %s1230_s27, 4  ;;  %s1967_s22 = scalar_lea.hbm %s2893_s5, 16  ;;  %s1962_s2 = int_to_ptr.hbm [resolvable:$true] %s1961_s2 }
 0x53c   : > { %s1963_s29 = scalar_lea.hbm %s1962_s2, 8  ;;  %p1968_p4 = scmp.lt.s32.totalorder %s1962_s2, %s2893_s5 }
 0x53d   : > { %p1964_p1 = scmp.ne.s32.totalorder %s1962_s2, %s1963_s29  ;;  %p1969_p9 = scmp.lt.s32.totalorder %s1967_s22, %s1963_s29 }
 0x53f   : > { %p1965_p6 = pnand %p1964_p1, %p2366_p3  ;;  %p1970_p7 = por %p1969_p9, %p1968_p4 }
 0x541   : > { %p1966_p2 = pneg %p1965_p6 }
 0x543   : > { %p1971_p8 = pnand %p1970_p7, %p1966_p2 }
 0x545   : > { %1974 = shalt.err (!%p1971_p8)
}
 0x546   : > { %1566 = dma.vmem_to_hbm [thread:$0]  (%p2366_p3), %s2692_s13, 128, %s1230_s27, %s1197_s16  }
 0x547 PF: > { %s2897_s19 = sld [smem:[#allocation39_spill]] }
 0x548   : > { %s2898_s6 = sld [smem:[#allocation28_spill]] }
 0x54d   : > { %p1593_p5 = scmp.ge.s32.totalorder %s2897_s19, 2 }
 0x54e   : > { %s1241_s24 = sand.u32 1, %s2898_s6  }
 0x54f   : > { %p1586_p10 = pnand %p1593_p5, %p2359_p11  ;;  %s1242_s0 = scalar_lea.sflag [#allocation11], %s1241_s24 }
 0x551   : > { %p1587_p0 = pneg %p1586_p10 }
 0x553   : > { %2058 = dma.done.wait (%p1587_p0), %s1242_s0, 256  }
 0x554   : > { %2060 = vsyncadd (%p1587_p0), %s1242_s0, 4294967040  ;;  %s2900_s17 = sld [smem:[#allocation32_spill]]  ;;  %p1589_p12 = pnand %p1593_p5, %p2373_p13 }
 0x556   : > { %p1590_p1 = pneg %p1589_p12 }
 0x55a   : > { %s1251_s23 = sand.u32 1, %s2900_s17  }
 0x55b   : > { %s1252_s1 = scalar_lea.sflag [#allocation20], %s1251_s23 }
 0x55c   : > { %2062 = dma.done.wait (%p1590_p1), %s1252_s1, 128  }
 0x55d   : > { %2064 = vsyncadd (%p1590_p1), %s1252_s1, 4294967168  ;;  %s47_s17 = sadd.s32 1, %s2897_s19   ;;  %s2903_s0 = sld [smem:[#allocation29_spill]] }
 0x55e   : > { %p2726_p3 = scmp.ge.s32.totalorder %s47_s17, 10   ;;  %s2904_s25 = sld [smem:[#allocation30_spill]] }
 0x55f   : > { %s2905_s23 = sld [smem:[#allocation45_spill]]  ;;  %s2907_s8 = smov %s2448_s9 }
 0x560   : > { %s2906_s24 = sld [smem:[#allocation31_spill]]  ;;  %s2917_s27 = smov %s2095_s28 }
 0x561   : > { %s2908_s30 = sld [smem:[#allocation33_spill]]  ;;  %s2922_s15 = smov %s2928_s21 }
 0x562   : > { %s2909_s29 = sld [smem:[#allocation43_spill]] }
 0x563   : > { %s2910_s12 = sld [smem:[#allocation37_spill]] }
 0x564   : > { %s2911_s11 = sld [smem:[#allocation38_spill]]  ;;  %s2914_s9 = smov %s2904_s25 }
 0x565   : > { %s2912_s16 = sld [smem:[#allocation41_spill]]  ;;  %s2915_s25 = smov %s2087_s26 }
 0x566   : > { %s2916_s26 = smov %s2907_s8  ;;  %46 = sbr.rel (!%p2726_p3) target bundleno = 32 (0x20), region = 191 }
 0x567   : > { %s2918_s28 = smov %s2908_s30  ;;  %s2919_s30 = smov %s2115_s14 }
 0x568   : > { %s2921_s14 = smov %s2924_s20 }
 0x56a   : > { %s2920_s13 = smov %s2911_s11 }
 0x56b   :  { %1258 = vsyncpa [#allocation10], 1 }
 0x56c   :  { %1260 = vsyncpa [#allocation10 + $0x1], 1 }
 0x56d   :  { %1261 = vsyncpa [#allocation13], 1 }
 0x56e   :  { %1263 = vsyncpa [#allocation13 + $0x1], 1 }
 0x56f   :  { %1264 = vsyncpa [#allocation16], 1 }
 0x570   :  { %1266 = vsyncpa [#allocation16 + $0x1], 1 }
 0x571   :  { %1267 = vsyncpa [#allocation11], 1 }
 0x572   :  { %1269 = vsyncpa [#allocation11 + $0x1], 1 }
 0x573   :  { %1270 = vsyncpa [#allocation20], 1 }
 0x574   :  { %1272 = vsyncpa [#allocation20 + $0x1], 1 }

</bundles_post_ra>
